<compile_context>
chip_gen: v5e
topology: v5e:2x2
jax: 0.10.0
libtpu: 0.0.40
codegen_flags: <defaults>
</compile_context>

<pallas_src>
import functools

import jax
import jax.numpy as jnp
from jax.experimental import pallas as pl
from jax.experimental.pallas import tpu as pltpu


# ----------------------------------------------------------------------------
# small helpers
# ----------------------------------------------------------------------------

def _erf(x):
    # Abramowitz & Stegun 7.1.26 (max abs error ~1.5e-7): only mul/add/div/exp,
    # guaranteed to lower in Mosaic (matches torch's exact-erf GELU to ~1e-7).
    a1, a2, a3, a4, a5 = 0.254829592, -0.284496736, 1.421413741, -1.453152027, 1.061405429
    p = 0.3275911
    sign = jnp.where(x < 0.0, -1.0, 1.0)
    ax = jnp.abs(x)
    t = 1.0 / (1.0 + p * ax)
    poly = ((((a5 * t + a4) * t + a3) * t + a2) * t + a1) * t
    return sign * (1.0 - poly * jnp.exp(-ax * ax))


def _gelu_exact(x):
    return 0.5 * x * (1.0 + _erf(x * 0.7071067811865476))


def _pick_spatial_tile(s, c2, budget_bytes=4 << 20):
    # Largest lane-dense (multiple-of-128) divisor of s whose (c2, ts) f32 output block
    # fits the VMEM budget; full axis when it already fits or cannot be tiled cleanly.
    if s * c2 * 4 <= budget_bytes or s % 128 != 0:
        return s
    best = None
    for t in range(128, s + 1, 128):
        if s % t == 0 and c2 * t * 4 <= budget_bytes:
            best = t
    return best if best is not None else s


def _pick_patch_tile(n_p, c2, pp, budget_bytes=2 << 20):
    # Largest multiple-of-8 divisor of n_p whose (c2, tnp, pp) f32 block fits the
    # budget; full axis when small or not cleanly divisible.
    if n_p * pp * c2 * 4 <= budget_bytes or n_p % 8 != 0:
        return n_p
    best = None
    for t in range(8, n_p + 1, 8):
        if n_p % t == 0 and c2 * t * pp * 4 <= budget_bytes:
            best = t
    return best if best is not None else n_p


# ----------------------------------------------------------------------------
# kernel 1: project_in  (1x1 conv == matmul over channels, spatial on lanes)
# ----------------------------------------------------------------------------

def _proj_in_kernel(x_ref, w_ref, b_ref, o_ref):
    x = x_ref[0].astype(jnp.float32)                 # (C, TS)
    w = w_ref[...].astype(jnp.float32)               # (C2, C)
    b = b_ref[...].astype(jnp.float32)               # (C2, 1)
    y = jnp.dot(w, x, preferred_element_type=jnp.float32) + b
    o_ref[0] = y.astype(o_ref.dtype)


def _project_in(x_bcs, w, b):
    bsz, c, s = x_bcs.shape
    c2 = w.shape[0]
    ts = _pick_spatial_tile(s, c2)
    return pl.pallas_call(
        _proj_in_kernel,
        out_shape=jax.ShapeDtypeStruct((bsz, c2, s), x_bcs.dtype),
        grid_spec=pltpu.PrefetchScalarGridSpec(
            num_scalar_prefetch=0,
            grid=(bsz, s // ts),
            in_specs=[
                pl.BlockSpec((1, c, ts), lambda i, j: (i, 0, j)),
                pl.BlockSpec((c2, c), lambda i, j: (0, 0)),
                pl.BlockSpec((c2, 1), lambda i, j: (0, 0)),
            ],
            out_specs=pl.BlockSpec((1, c2, ts), lambda i, j: (i, 0, j)),
        ),
        compiler_params=pltpu.CompilerParams(
            dimension_semantics=("parallel", "parallel")),
    )(x_bcs, w, b)


# ----------------------------------------------------------------------------
# kernel 2: per-patch frequency filter as a per-channel (64,64) matmul
# ----------------------------------------------------------------------------

def _patch_filter_kernel(x_ref, m_ref, o_ref):
    xp = x_ref[0].astype(jnp.float32)                # (C2, TNP, p*p)
    m = m_ref[...].astype(jnp.float32)               # (C2, p*p, p*p)
    y = jax.lax.dot_general(
        xp, m,
        dimension_numbers=(((2,), (1,)), ((0,), (0,))),
        preferred_element_type=jnp.float32)          # (C2, TNP, p*p)
    o_ref[0] = y.astype(o_ref.dtype)


def _patch_filter(x_patches, m):
    bsz, c2, n_p, pp = x_patches.shape
    tnp = _pick_patch_tile(n_p, c2, pp)
    return pl.pallas_call(
        _patch_filter_kernel,
        out_shape=jax.ShapeDtypeStruct((bsz, c2, n_p, pp), x_patches.dtype),
        grid_spec=pltpu.PrefetchScalarGridSpec(
            num_scalar_prefetch=0,
            grid=(bsz, n_p // tnp),
            in_specs=[
                pl.BlockSpec((1, c2, tnp, pp), lambda i, j: (i, 0, j, 0)),
                pl.BlockSpec((c2, pp, pp), lambda i, j: (0, 0, 0)),
            ],
            out_specs=pl.BlockSpec((1, c2, tnp, pp), lambda i, j: (i, 0, j, 0)),
        ),
        compiler_params=pltpu.CompilerParams(
            dimension_semantics=("parallel", "parallel")),
    )(x_patches, m)


def _build_fft_operator(fft_w, p):
    # rfft2 -> (* real fft_w) -> irfft2 is linear in the (p,p) patch.  Fold it into
    # a (p*p, p*p) matrix per channel by pushing the identity basis through the
    # exact same transform (parameter-only preprocessing; exact up to float rounding).
    c2 = fft_w.shape[0]
    w = fft_w.reshape(c2, p, p // 2 + 1).astype(jnp.float32)
    eye = jnp.eye(p * p, dtype=jnp.float32).reshape(p * p, p, p)
    ef = jnp.fft.rfft2(eye)                                   # (p*p, p, p//2+1)
    prod = ef[None, :, :, :] * w[:, None, :, :]               # (C2, p*p, p, p//2+1)
    k = jnp.fft.irfft2(prod, s=(p, p))                        # (C2, p*p, p, p)
    return k.reshape(c2, p * p, p * p).astype(jnp.float32)    # rows: images of basis


# ----------------------------------------------------------------------------
# kernel 3: fused depthwise 3x3 conv + GELU gating + project_out
# ----------------------------------------------------------------------------

def _dwconv_gate_out_kernel(x1_ref, x2_ref, w1_ref, b1_ref, w2_ref, b2_ref,
                            pw_ref, pb_ref, o_ref, *, width):
    x1 = x1_ref[0, 0].astype(jnp.float32)            # (Hf, S)  first half channels
    x2 = x2_ref[0, 0].astype(jnp.float32)            # (Hf, S)  second half channels
    hf, s_len = x1.shape
    col = jax.lax.broadcasted_iota(jnp.int32, (1, s_len), 1) % width
    not_left = col != 0                               # w-1 stays in the row
    not_right = col != (width - 1)                    # w+1 stays in the row

    def dwconv(x, taps, bias):
        acc = jnp.zeros_like(x)
        k = 0
        for dh in (-1, 0, 1):
            for dw in (-1, 0, 1):
                shift = dh * width + dw              # read x[n + shift] (flat h*W + w)
                if shift > 0:
                    shifted = jnp.concatenate(
                        [x[:, shift:], jnp.zeros((hf, shift), jnp.float32)], axis=1)
                elif shift < 0:
                    shifted = jnp.concatenate(
                        [jnp.zeros((hf, -shift), jnp.float32), x[:, :shift]], axis=1)
                else:
                    shifted = x
                # zero-fill above handles rows that fall off the top/bottom of the
                # image; the column masks handle left/right image borders.
                if dw == -1:
                    shifted = jnp.where(not_left, shifted, 0.0)
                elif dw == 1:
                    shifted = jnp.where(not_right, shifted, 0.0)
                acc = acc + taps[:, k:k + 1] * shifted
                k += 1
        return acc + bias

    y1 = dwconv(x1, w1_ref[...].astype(jnp.float32), b1_ref[...].astype(jnp.float32))
    y2 = dwconv(x2, w2_ref[...].astype(jnp.float32), b2_ref[...].astype(jnp.float32))
    g = _gelu_exact(y1) * y2                          # (Hf, S)

    pw = pw_ref[...].astype(jnp.float32)              # (dim, Hf)
    pb = pb_ref[...].astype(jnp.float32)              # (dim, 1)
    out = jnp.dot(pw, g, preferred_element_type=jnp.float32) + pb
    o_ref[0] = out.astype(o_ref.dtype)


def _dwconv_gate_project_out(x4, w1, b1, w2, b2, pw, pb, *, width):
    # x4: (B, 2, Hf, S) view of the (B, 2*Hf, H, W) activation (pure reshape, no copy).
    # The same array is passed twice with different channel-half block offsets so the
    # gating fusion never needs a sublane slice at a non-8-aligned offset.
    bsz, _, hf, s = x4.shape
    dim = pw.shape[0]
    kernel = functools.partial(_dwconv_gate_out_kernel, width=width)
    # TODO(synk): for large H*W, tile the spatial axis with a one-row halo instead of
    #             one full image per block.
    return pl.pallas_call(
        kernel,
        out_shape=jax.ShapeDtypeStruct((bsz, dim, s), x4.dtype),
        grid_spec=pltpu.PrefetchScalarGridSpec(
            num_scalar_prefetch=0,
            grid=(bsz,),
            in_specs=[
                pl.BlockSpec((1, 1, hf, s), lambda i: (i, 0, 0, 0)),
                pl.BlockSpec((1, 1, hf, s), lambda i: (i, 1, 0, 0)),
                pl.BlockSpec((hf, 9), lambda i: (0, 0)),
                pl.BlockSpec((hf, 1), lambda i: (0, 0)),
                pl.BlockSpec((hf, 9), lambda i: (0, 0)),
                pl.BlockSpec((hf, 1), lambda i: (0, 0)),
                pl.BlockSpec((dim, hf), lambda i: (0, 0)),
                pl.BlockSpec((dim, 1), lambda i: (0, 0)),
            ],
            out_specs=pl.BlockSpec((1, dim, s), lambda i: (i, 0, 0)),
        ),
        compiler_params=pltpu.CompilerParams(dimension_semantics=("parallel",)),
    )(x4, x4, w1, b1, w2, b2, pw, pb)


# ----------------------------------------------------------------------------
# full DFFN forward
# ----------------------------------------------------------------------------

def dffn_forward(x, params, *, patch_size=8):
    b, c, h, w = x.shape
    w_in, b_in = params["w_in"], params["b_in"]        # (C2, C), (C2,)
    fft_w = params["fft"]                              # (C2, 1, 1, p, p//2+1)
    dw_w, dw_b = params["dw_w"], params["dw_b"]        # (C2, 3, 3), (C2,)
    w_out, b_out = params["w_out"], params["b_out"]    # (dim, Hf), (dim,)
    c2 = w_in.shape[0]
    hf = c2 // 2
    s = h * w
    p = patch_size
    nh, nw = h // p, w // p
    n_p = nh * nw

    # 0) patch-order rearrangement done on the *input* (C channels: cheapest place,
    #    since project_in is pointwise over space it can run in patch order).
    x_pf = (x.reshape(b, c, nh, p, nw, p)
              .transpose(0, 1, 2, 4, 3, 5)
              .reshape(b, c, s))                                         # (B, C, S)

    # 1) project_in: 1x1 conv, channels on sublanes, patch-flattened space on lanes.
    y = _project_in(x_pf, w_in, b_in.reshape(c2, 1))                     # (B, C2, S)

    # 2) per-patch frequency filter (folded FFT) as a per-channel (64,64) matmul.
    #    The reshape below is a free row-major view: (S) == (nP, p*p).
    m = _build_fft_operator(fft_w, p)                                    # (C2, 64, 64)
    yp = _patch_filter(y.reshape(b, c2, n_p, p * p), m)

    # back to image order (only reverse rearrangement touches the C2-wide tensor).
    y = (yp.reshape(b, c2, nh, nw, p, p)
           .transpose(0, 1, 2, 4, 3, 5)
           .reshape(b, c2, s))

    # 3) fused depthwise 3x3 conv + exact GELU gate + project_out.
    x4 = y.reshape(b, 2, hf, s)
    out = _dwconv_gate_project_out(
        x4,
        dw_w[:hf].reshape(hf, 9), dw_b[:hf].reshape(hf, 1),
        dw_w[hf:].reshape(hf, 9), dw_b[hf:].reshape(hf, 1),
        w_out, b_out.reshape(-1, 1), width=w)
    return out.reshape(b, -1, h, w)


# ----------------------------------------------------------------------------
# pure-JAX reference (mirrors the PyTorch module op-by-op)
# ----------------------------------------------------------------------------

def dffn_reference(x, params, *, patch_size=8):
    p = patch_size
    b, c, h, w = x.shape
    w_in, b_in = params["w_in"], params["b_in"]
    fft_w = params["fft"]
    dw_w, dw_b = params["dw_w"], params["dw_b"]
    w_out, b_out = params["w_out"], params["b_out"]
    c2 = w_in.shape[0]
    hf = c2 // 2
    hi = jax.lax.Precision.HIGHEST

    y = jnp.einsum("oc,bchw->bohw", w_in, x, precision=hi) + b_in[None, :, None, None]

    yp = y.reshape(b, c2, h // p, p, w // p, p).transpose(0, 1, 2, 4, 3, 5)
    yf = jnp.fft.rfft2(yp.astype(jnp.float32)) * fft_w
    yp = jnp.fft.irfft2(yf, s=(p, p))
    y = yp.transpose(0, 1, 2, 4, 3, 5).reshape(b, c2, h, w)

    ypad = jnp.pad(y, ((0, 0), (0, 0), (1, 1), (1, 1)))
    dw = jnp.zeros_like(y)
    for i in range(3):
        for j in range(3):
            dw = dw + dw_w[:, i, j][None, :, None, None] * ypad[:, :, i:i + h, j:j + w]
    dw = dw + dw_b[None, :, None, None]

    x1, x2 = dw[:, :hf], dw[:, hf:]
    g = jax.nn.gelu(x1, approximate=False) * x2
    return jnp.einsum("oc,bchw->bohw", w_out, g, precision=hi) + b_out[None, :, None, None]


# ----------------------------------------------------------------------------
# demo / self-check
# ----------------------------------------------------------------------------

if __name__ == "__main__":
    key = jax.random.PRNGKey(0)
    B, DIM, H, W = 2, 4, 16, 16
    FFN_FACTOR = 2.0
    HF = int(DIM * FFN_FACTOR)
    C2 = HF * 2

    ks = jax.random.split(key, 8)
    sc = 0.2
    params = dict(
        w_in=sc * jax.random.normal(ks[0], (C2, DIM), jnp.float32),
        b_in=sc * jax.random.normal(ks[1], (C2,), jnp.float32),
        fft=1.0 + 0.25 * jax.random.normal(ks[2], (C2, 1, 1, 8, 5), jnp.float32),
        dw_w=sc * jax.random.normal(ks[3], (C2, 3, 3), jnp.float32),
        dw_b=sc * jax.random.normal(ks[4], (C2,), jnp.float32),
        w_out=sc * jax.random.normal(ks[5], (DIM, HF), jnp.float32),
        b_out=sc * jax.random.normal(ks[6], (DIM,), jnp.float32),
    )
    x = jax.random.normal(ks[7], (B, DIM, H, W), jnp.float32)

    out = jax.jit(dffn_forward)(x, params)
    out = jax.block_until_ready(out)
    ref = dffn_reference(x, params)

    if out.shape == ref.shape and bool(jnp.allclose(out, ref, atol=1e-3, rtol=1e-3)):
        print("KERNEL_OK")
    else:
        print("mismatch: max abs err =", float(jnp.max(jnp.abs(out - ref))))
</pallas_src>

<mosaic_0001>
module attributes {stable_mosaic.version = 11 : i64} {
  func.func @_proj_in_kernel(%arg0: i32, %arg1: i32, %arg2: memref<1x4x256xf32, #tpu.memory_space<vmem>>, %arg3: memref<16x4xf32, #tpu.memory_space<vmem>>, %arg4: memref<16x1xf32, #tpu.memory_space<vmem>>, %arg5: memref<1x16x256xf32, #tpu.memory_space<vmem>>) attributes {dimension_semantics = [#tpu.dimension_semantics<parallel>, #tpu.dimension_semantics<parallel>], iteration_bounds = array<i64: 2, 1>, scalar_prefetch = 0 : i64, scratch_operands = 0 : i64, tpu.core_type = #tpu.core_type<tc>, window_params = [{transform_indices = @transform_0, window_bounds = array<i64: 1, 4, 256>}, {pipeline_mode = #tpu.pipeline_mode<synchronous>, transform_indices = @transform_1, window_bounds = array<i64: 16, 4>}, {pipeline_mode = #tpu.pipeline_mode<synchronous>, transform_indices = @transform_2, window_bounds = array<i64: 16, 1>}, {transform_indices = @transform_3, window_bounds = array<i64: 1, 16, 256>}]} {
    %c0 = arith.constant 0 : index
    %c0_0 = arith.constant 0 : index
    %c0_1 = arith.constant 0 : index
    %0 = vector.load %arg2[%c0, %c0_0, %c0_1] : memref<1x4x256xf32, #tpu.memory_space<vmem>>, vector<1x4x256xf32>
    %1 = vector.shape_cast %0 : vector<1x4x256xf32> to vector<4x256xf32>
    %c0_2 = arith.constant 0 : index
    %c0_3 = arith.constant 0 : index
    %2 = vector.load %arg3[%c0_2, %c0_3] : memref<16x4xf32, #tpu.memory_space<vmem>>, vector<16x4xf32>
    %c0_4 = arith.constant 0 : index
    %c0_5 = arith.constant 0 : index
    %3 = vector.load %arg4[%c0_4, %c0_5] : memref<16x1xf32, #tpu.memory_space<vmem>>, vector<16x1xf32>
    %cst = arith.constant dense<0.000000e+00> : vector<16x256xf32>
    %4 = tpu.matmul %2, %1, %cst {dimension_numbers = #tpu.dot_dimension_numbers<[1], [0], [0], [1], [0, 0, 1, 1], [], []>} : vector<16x4xf32>, vector<4x256xf32>, vector<16x256xf32> -> vector<16x256xf32>
    %5 = vector.broadcast %3 : vector<16x1xf32> to vector<16x256xf32>
    %6 = arith.addf %4, %5 : vector<16x256xf32>
    %c0_6 = arith.constant 0 : index
    %c0_7 = arith.constant 0 : index
    %c0_8 = arith.constant 0 : index
    %7 = vector.load %arg5[%c0_6, %c0_7, %c0_8] : memref<1x16x256xf32, #tpu.memory_space<vmem>>, vector<1x16x256xf32>
    %8 = vector.shape_cast %7 : vector<1x16x256xf32> to vector<16x256xf32>
    %9 = vector.shape_cast %6 : vector<16x256xf32> to vector<1x16x256xf32>
    tpu.vector_store %arg5[%c0_6, %c0_7, %c0_8], %9 {strides = array<i32>} : memref<1x16x256xf32, #tpu.memory_space<vmem>>, vector<1x16x256xf32>,
    return
  }
  func.func @transform_0(%arg0: i32, %arg1: i32) -> (i32, i32, i32) {
    %c0_i32 = arith.constant 0 : i32
    %c0_i32_0 = arith.constant 0 : i32
    return %arg0, %c0_i32, %arg1 : i32, i32, i32
  }
  func.func @transform_1(%arg0: i32, %arg1: i32) -> (i32, i32) {
    %c0_i32 = arith.constant 0 : i32
    %c0_i32_0 = arith.constant 0 : i32
    %c0_i32_1 = arith.constant 0 : i32
    return %c0_i32, %c0_i32_0 : i32, i32
  }
  func.func @transform_2(%arg0: i32, %arg1: i32) -> (i32, i32) {
    %c0_i32 = arith.constant 0 : i32
    %c0_i32_0 = arith.constant 0 : i32
    %c0_i32_1 = arith.constant 0 : i32
    return %c0_i32, %c0_i32_0 : i32, i32
  }
  func.func @transform_3(%arg0: i32, %arg1: i32) -> (i32, i32, i32) {
    %c0_i32 = arith.constant 0 : i32
    %c0_i32_0 = arith.constant 0 : i32
    return %arg0, %c0_i32, %arg1 : i32, i32, i32
  }
}

module attributes {stable_mosaic.version = 11 : i64} {
  func.func @_patch_filter_kernel(%arg0: i32, %arg1: i32, %arg2: memref<1x16x4x64xf32, #tpu.memory_space<vmem>>, %arg3: memref<16x64x64xf32, #tpu.memory_space<vmem>>, %arg4: memref<1x16x4x64xf32, #tpu.memory_space<vmem>>) attributes {dimension_semantics = [#tpu.dimension_semantics<parallel>, #tpu.dimension_semantics<parallel>], iteration_bounds = array<i64: 2, 1>, scalar_prefetch = 0 : i64, scratch_operands = 0 : i64, tpu.core_type = #tpu.core_type<tc>, window_params = [{transform_indices = @transform_0, window_bounds = array<i64: 1, 16, 4, 64>}, {pipeline_mode = #tpu.pipeline_mode<synchronous>, transform_indices = @transform_1, window_bounds = array<i64: 16, 64, 64>}, {transform_indices = @transform_2, window_bounds = array<i64: 1, 16, 4, 64>}]} {
    %c0 = arith.constant 0 : index
    %c0_0 = arith.constant 0 : index
    %c0_1 = arith.constant 0 : index
    %c0_2 = arith.constant 0 : index
    %0 = vector.load %arg2[%c0, %c0_0, %c0_1, %c0_2] : memref<1x16x4x64xf32, #tpu.memory_space<vmem>>, vector<1x16x4x64xf32>
    %1 = vector.shape_cast %0 : vector<1x16x4x64xf32> to vector<16x4x64xf32>
    %c0_3 = arith.constant 0 : index
    %c0_4 = arith.constant 0 : index
    %c0_5 = arith.constant 0 : index
    %2 = vector.load %arg3[%c0_3, %c0_4, %c0_5] : memref<16x64x64xf32, #tpu.memory_space<vmem>>, vector<16x64x64xf32>
    %cst = arith.constant dense<0.000000e+00> : vector<16x4x64xf32>
    %3 = tpu.matmul %1, %2, %cst {dimension_numbers = #tpu.dot_dimension_numbers<[2], [1], [1], [2], [0, 0, 0, 1, 1, 2], [0], [0]>} : vector<16x4x64xf32>, vector<16x64x64xf32>, vector<16x4x64xf32> -> vector<16x4x64xf32>
    %c0_6 = arith.constant 0 : index
    %c0_7 = arith.constant 0 : index
    %c0_8 = arith.constant 0 : index
    %c0_9 = arith.constant 0 : index
    %4 = vector.load %arg4[%c0_6, %c0_7, %c0_8, %c0_9] : memref<1x16x4x64xf32, #tpu.memory_space<vmem>>, vector<1x16x4x64xf32>
    %5 = vector.shape_cast %4 : vector<1x16x4x64xf32> to vector<16x4x64xf32>
    %6 = vector.shape_cast %3 : vector<16x4x64xf32> to vector<1x16x4x64xf32>
    tpu.vector_store %arg4[%c0_6, %c0_7, %c0_8, %c0_9], %6 {strides = array<i32>} : memref<1x16x4x64xf32, #tpu.memory_space<vmem>>, vector<1x16x4x64xf32>,
    return
  }
  func.func @transform_0(%arg0: i32, %arg1: i32) -> (i32, i32, i32, i32) {
    %c0_i32 = arith.constant 0 : i32
    %c0_i32_0 = arith.constant 0 : i32
    %c0_i32_1 = arith.constant 0 : i32
    return %arg0, %c0_i32, %arg1, %c0_i32_0 : i32, i32, i32, i32
  }
  func.func @transform_1(%arg0: i32, %arg1: i32) -> (i32, i32, i32) {
    %c0_i32 = arith.constant 0 : i32
    %c0_i32_0 = arith.constant 0 : i32
    %c0_i32_1 = arith.constant 0 : i32
    %c0_i32_2 = arith.constant 0 : i32
    return %c0_i32, %c0_i32_0, %c0_i32_1 : i32, i32, i32
  }
  func.func @transform_2(%arg0: i32, %arg1: i32) -> (i32, i32, i32, i32) {
    %c0_i32 = arith.constant 0 : i32
    %c0_i32_0 = arith.constant 0 : i32
    %c0_i32_1 = arith.constant 0 : i32
    return %arg0, %c0_i32, %arg1, %c0_i32_0 : i32, i32, i32, i32
  }
}

module attributes {stable_mosaic.version = 11 : i64} {
  func.func @_dwconv_gate_out_kernel(%arg0: i32, %arg1: memref<1x1x8x256xf32, #tpu.memory_space<vmem>>, %arg2: memref<1x1x8x256xf32, #tpu.memory_space<vmem>>, %arg3: memref<8x9xf32, #tpu.memory_space<vmem>>, %arg4: memref<8x1xf32, #tpu.memory_space<vmem>>, %arg5: memref<8x9xf32, #tpu.memory_space<vmem>>, %arg6: memref<8x1xf32, #tpu.memory_space<vmem>>, %arg7: memref<4x8xf32, #tpu.memory_space<vmem>>, %arg8: memref<4x1xf32, #tpu.memory_space<vmem>>, %arg9: memref<1x4x256xf32, #tpu.memory_space<vmem>>) attributes {dimension_semantics = [#tpu.dimension_semantics<parallel>], iteration_bounds = array<i64: 2>, scalar_prefetch = 0 : i64, scratch_operands = 0 : i64, tpu.core_type = #tpu.core_type<tc>, window_params = [{transform_indices = @transform_0, window_bounds = array<i64: 1, 1, 8, 256>}, {transform_indices = @transform_1, window_bounds = array<i64: 1, 1, 8, 256>}, {pipeline_mode = #tpu.pipeline_mode<synchronous>, transform_indices = @transform_2, window_bounds = array<i64: 8, 9>}, {pipeline_mode = #tpu.pipeline_mode<synchronous>, transform_indices = @transform_3, window_bounds = array<i64: 8, 1>}, {pipeline_mode = #tpu.pipeline_mode<synchronous>, transform_indices = @transform_4, window_bounds = array<i64: 8, 9>}, {pipeline_mode = #tpu.pipeline_mode<synchronous>, transform_indices = @transform_5, window_bounds = array<i64: 8, 1>}, {pipeline_mode = #tpu.pipeline_mode<synchronous>, transform_indices = @transform_6, window_bounds = array<i64: 4, 8>}, {pipeline_mode = #tpu.pipeline_mode<synchronous>, transform_indices = @transform_7, window_bounds = array<i64: 4, 1>}, {transform_indices = @transform_8, window_bounds = array<i64: 1, 4, 256>}]} {
    %c0 = arith.constant 0 : index
    %c0_0 = arith.constant 0 : index
    %c0_1 = arith.constant 0 : index
    %c0_2 = arith.constant 0 : index
    %0 = vector.load %arg1[%c0, %c0_0, %c0_1, %c0_2] : memref<1x1x8x256xf32, #tpu.memory_space<vmem>>, vector<1x1x8x256xf32>
    %1 = vector.shape_cast %0 : vector<1x1x8x256xf32> to vector<8x256xf32>
    %c0_3 = arith.constant 0 : index
    %c0_4 = arith.constant 0 : index
    %c0_5 = arith.constant 0 : index
    %c0_6 = arith.constant 0 : index
    %2 = vector.load %arg2[%c0_3, %c0_4, %c0_5, %c0_6] : memref<1x1x8x256xf32, #tpu.memory_space<vmem>>, vector<1x1x8x256xf32>
    %3 = vector.shape_cast %2 : vector<1x1x8x256xf32> to vector<8x256xf32>
    %4 = tpu.iota {dimensions = array<i32: 1>} : vector<1x256xi32>
    %c16_i32 = arith.constant 16 : i32
    %c0_i32 = arith.constant 0 : i32
    %5 = arith.cmpi eq, %c16_i32, %c0_i32 : i32
    %c1_i32 = arith.constant 1 : i32
    %6 = arith.select %5, %c1_i32, %c16_i32 : i32
    %7 = vector.broadcast %6 : i32 to vector<1x256xi32>
    %8 = arith.remsi %4, %7 : vector<1x256xi32>
    %c0_i32_7 = arith.constant 0 : i32
    %9 = vector.broadcast %c0_i32_7 : i32 to vector<1x256xi32>
    %10 = arith.cmpi ne, %8, %9 : vector<1x256xi32>
    %c0_i32_8 = arith.constant 0 : i32
    %11 = vector.broadcast %c0_i32_8 : i32 to vector<1x256xi32>
    %12 = arith.cmpi slt, %8, %11 : vector<1x256xi32>
    %c0_i32_9 = arith.constant 0 : i32
    %13 = arith.cmpi slt, %6, %c0_i32_9 : i32
    %14 = vector.broadcast %13 : i1 to vector<1x256xi1>
    %15 = vector.broadcast %14 : vector<1x256xi1> to vector<1x256xi1>
    %16 = arith.xori %12, %15 : vector<1x256xi1>
    %17 = arith.andi %16, %10 : vector<1x256xi1>
    %18 = vector.broadcast %6 : i32 to vector<1x256xi32>
    %19 = arith.addi %8, %18 : vector<1x256xi32>
    %20 = arith.select %17, %19, %8 : vector<1x256xi1>, vector<1x256xi32>
    %c0_i32_10 = arith.constant 0 : i32
    %21 = vector.broadcast %c0_i32_10 : i32 to vector<1x256xi32>
    %22 = arith.cmpi ne, %20, %21 : vector<1x256xi32>
    %c15_i32 = arith.constant 15 : i32
    %23 = vector.broadcast %c15_i32 : i32 to vector<1x256xi32>
    %24 = arith.cmpi ne, %20, %23 : vector<1x256xi32>
    %c0_11 = arith.constant 0 : index
    %c0_12 = arith.constant 0 : index
    %25 = vector.load %arg3[%c0_11, %c0_12] : memref<8x9xf32, #tpu.memory_space<vmem>>, vector<8x9xf32>
    %c0_13 = arith.constant 0 : index
    %c0_14 = arith.constant 0 : index
    %26 = vector.load %arg4[%c0_13, %c0_14] : memref<8x1xf32, #tpu.memory_space<vmem>>, vector<8x1xf32>
    %cst = arith.constant 0.000000e+00 : f32
    %27 = vector.broadcast %cst : f32 to vector<8x256xf32>
    %cst_15 = arith.constant 0.000000e+00 : f32
    %28 = vector.broadcast %cst_15 : f32 to vector<8x17xf32>
    %29 = vector.extract_strided_slice %1 {offsets = [0, 0], sizes = [8, 239], strides = [1, 1]} : vector<8x256xf32> to vector<8x239xf32>
    %30 = tpu.concatenate %28, %29 in 1 : vector<8x17xf32>, vector<8x239xf32> -> vector<8x256xf32>
    %cst_16 = arith.constant 0.000000e+00 : f32
    %31 = vector.shape_cast %22 : vector<1x256xi1> to vector<1x256xi1>
    %32 = vector.broadcast %31 : vector<1x256xi1> to vector<8x256xi1>
    %33 = vector.broadcast %cst_16 : f32 to vector<8x256xf32>
    %34 = arith.select %32, %30, %33 : vector<8x256xi1>, vector<8x256xf32>
    %35 = vector.extract_strided_slice %25 {offsets = [0, 0], sizes = [8, 1], strides = [1, 1]} : vector<8x9xf32> to vector<8x1xf32>
    %36 = vector.broadcast %35 : vector<8x1xf32> to vector<8x256xf32>
    %37 = arith.mulf %36, %34 : vector<8x256xf32>
    %38 = arith.addf %27, %37 : vector<8x256xf32>
    %cst_17 = arith.constant 0.000000e+00 : f32
    %39 = vector.broadcast %cst_17 : f32 to vector<8x16xf32>
    %40 = vector.extract_strided_slice %1 {offsets = [0, 0], sizes = [8, 240], strides = [1, 1]} : vector<8x256xf32> to vector<8x240xf32>
    %41 = tpu.concatenate %39, %40 in 1 : vector<8x16xf32>, vector<8x240xf32> -> vector<8x256xf32>
    %42 = vector.extract_strided_slice %25 {offsets = [0, 1], sizes = [8, 1], strides = [1, 1]} : vector<8x9xf32> to vector<8x1xf32>
    %43 = vector.broadcast %42 : vector<8x1xf32> to vector<8x256xf32>
    %44 = arith.mulf %43, %41 : vector<8x256xf32>
    %45 = arith.addf %38, %44 : vector<8x256xf32>
    %cst_18 = arith.constant 0.000000e+00 : f32
    %46 = vector.broadcast %cst_18 : f32 to vector<8x15xf32>
    %47 = vector.extract_strided_slice %1 {offsets = [0, 0], sizes = [8, 241], strides = [1, 1]} : vector<8x256xf32> to vector<8x241xf32>
    %48 = tpu.concatenate %46, %47 in 1 : vector<8x15xf32>, vector<8x241xf32> -> vector<8x256xf32>
    %cst_19 = arith.constant 0.000000e+00 : f32
    %49 = vector.shape_cast %24 : vector<1x256xi1> to vector<1x256xi1>
    %50 = vector.broadcast %49 : vector<1x256xi1> to vector<8x256xi1>
    %51 = vector.broadcast %cst_19 : f32 to vector<8x256xf32>
    %52 = arith.select %50, %48, %51 : vector<8x256xi1>, vector<8x256xf32>
    %53 = vector.extract_strided_slice %25 {offsets = [0, 2], sizes = [8, 1], strides = [1, 1]} : vector<8x9xf32> to vector<8x1xf32>
    %54 = vector.broadcast %53 : vector<8x1xf32> to vector<8x256xf32>
    %55 = arith.mulf %54, %52 : vector<8x256xf32>
    %56 = arith.addf %45, %55 : vector<8x256xf32>
    %cst_20 = arith.constant 0.000000e+00 : f32
    %57 = vector.broadcast %cst_20 : f32 to vector<8x1xf32>
    %58 = vector.extract_strided_slice %1 {offsets = [0, 0], sizes = [8, 255], strides = [1, 1]} : vector<8x256xf32> to vector<8x255xf32>
    %59 = tpu.concatenate %57, %58 in 1 : vector<8x1xf32>, vector<8x255xf32> -> vector<8x256xf32>
    %cst_21 = arith.constant 0.000000e+00 : f32
    %60 = vector.shape_cast %22 : vector<1x256xi1> to vector<1x256xi1>
    %61 = vector.broadcast %60 : vector<1x256xi1> to vector<8x256xi1>
    %62 = vector.broadcast %cst_21 : f32 to vector<8x256xf32>
    %63 = arith.select %61, %59, %62 : vector<8x256xi1>, vector<8x256xf32>
    %64 = vector.extract_strided_slice %25 {offsets = [0, 3], sizes = [8, 1], strides = [1, 1]} : vector<8x9xf32> to vector<8x1xf32>
    %65 = vector.broadcast %64 : vector<8x1xf32> to vector<8x256xf32>
    %66 = arith.mulf %65, %63 : vector<8x256xf32>
    %67 = arith.addf %56, %66 : vector<8x256xf32>
    %68 = vector.extract_strided_slice %25 {offsets = [0, 4], sizes = [8, 1], strides = [1, 1]} : vector<8x9xf32> to vector<8x1xf32>
    %69 = vector.broadcast %68 : vector<8x1xf32> to vector<8x256xf32>
    %70 = arith.mulf %69, %1 : vector<8x256xf32>
    %71 = arith.addf %67, %70 : vector<8x256xf32>
    %72 = vector.extract_strided_slice %1 {offsets = [0, 1], sizes = [8, 255], strides = [1, 1]} : vector<8x256xf32> to vector<8x255xf32>
    %cst_22 = arith.constant 0.000000e+00 : f32
    %73 = vector.broadcast %cst_22 : f32 to vector<8x1xf32>
    %74 = tpu.concatenate %72, %73 in 1 : vector<8x255xf32>, vector<8x1xf32> -> vector<8x256xf32>
    %cst_23 = arith.constant 0.000000e+00 : f32
    %75 = vector.shape_cast %24 : vector<1x256xi1> to vector<1x256xi1>
    %76 = vector.broadcast %75 : vector<1x256xi1> to vector<8x256xi1>
    %77 = vector.broadcast %cst_23 : f32 to vector<8x256xf32>
    %78 = arith.select %76, %74, %77 : vector<8x256xi1>, vector<8x256xf32>
    %79 = vector.extract_strided_slice %25 {offsets = [0, 5], sizes = [8, 1], strides = [1, 1]} : vector<8x9xf32> to vector<8x1xf32>
    %80 = vector.broadcast %79 : vector<8x1xf32> to vector<8x256xf32>
    %81 = arith.mulf %80, %78 : vector<8x256xf32>
    %82 = arith.addf %71, %81 : vector<8x256xf32>
    %83 = vector.extract_strided_slice %1 {offsets = [0, 15], sizes = [8, 241], strides = [1, 1]} : vector<8x256xf32> to vector<8x241xf32>
    %cst_24 = arith.constant 0.000000e+00 : f32
    %84 = vector.broadcast %cst_24 : f32 to vector<8x15xf32>
    %85 = tpu.concatenate %83, %84 in 1 : vector<8x241xf32>, vector<8x15xf32> -> vector<8x256xf32>
    %cst_25 = arith.constant 0.000000e+00 : f32
    %86 = vector.shape_cast %22 : vector<1x256xi1> to vector<1x256xi1>
    %87 = vector.broadcast %86 : vector<1x256xi1> to vector<8x256xi1>
    %88 = vector.broadcast %cst_25 : f32 to vector<8x256xf32>
    %89 = arith.select %87, %85, %88 : vector<8x256xi1>, vector<8x256xf32>
    %90 = vector.extract_strided_slice %25 {offsets = [0, 6], sizes = [8, 1], strides = [1, 1]} : vector<8x9xf32> to vector<8x1xf32>
    %91 = vector.broadcast %90 : vector<8x1xf32> to vector<8x256xf32>
    %92 = arith.mulf %91, %89 : vector<8x256xf32>
    %93 = arith.addf %82, %92 : vector<8x256xf32>
    %94 = vector.extract_strided_slice %1 {offsets = [0, 16], sizes = [8, 240], strides = [1, 1]} : vector<8x256xf32> to vector<8x240xf32>
    %cst_26 = arith.constant 0.000000e+00 : f32
    %95 = vector.broadcast %cst_26 : f32 to vector<8x16xf32>
    %96 = tpu.concatenate %94, %95 in 1 : vector<8x240xf32>, vector<8x16xf32> -> vector<8x256xf32>
    %97 = vector.extract_strided_slice %25 {offsets = [0, 7], sizes = [8, 1], strides = [1, 1]} : vector<8x9xf32> to vector<8x1xf32>
    %98 = vector.broadcast %97 : vector<8x1xf32> to vector<8x256xf32>
    %99 = arith.mulf %98, %96 : vector<8x256xf32>
    %100 = arith.addf %93, %99 : vector<8x256xf32>
    %101 = vector.extract_strided_slice %1 {offsets = [0, 17], sizes = [8, 239], strides = [1, 1]} : vector<8x256xf32> to vector<8x239xf32>
    %cst_27 = arith.constant 0.000000e+00 : f32
    %102 = vector.broadcast %cst_27 : f32 to vector<8x17xf32>
    %103 = tpu.concatenate %101, %102 in 1 : vector<8x239xf32>, vector<8x17xf32> -> vector<8x256xf32>
    %cst_28 = arith.constant 0.000000e+00 : f32
    %104 = vector.shape_cast %24 : vector<1x256xi1> to vector<1x256xi1>
    %105 = vector.broadcast %104 : vector<1x256xi1> to vector<8x256xi1>
    %106 = vector.broadcast %cst_28 : f32 to vector<8x256xf32>
    %107 = arith.select %105, %103, %106 : vector<8x256xi1>, vector<8x256xf32>
    %108 = vector.extract_strided_slice %25 {offsets = [0, 8], sizes = [8, 1], strides = [1, 1]} : vector<8x9xf32> to vector<8x1xf32>
    %109 = vector.broadcast %108 : vector<8x1xf32> to vector<8x256xf32>
    %110 = arith.mulf %109, %107 : vector<8x256xf32>
    %111 = arith.addf %100, %110 : vector<8x256xf32>
    %112 = vector.broadcast %26 : vector<8x1xf32> to vector<8x256xf32>
    %113 = arith.addf %111, %112 : vector<8x256xf32>
    %c0_29 = arith.constant 0 : index
    %c0_30 = arith.constant 0 : index
    %114 = vector.load %arg5[%c0_29, %c0_30] : memref<8x9xf32, #tpu.memory_space<vmem>>, vector<8x9xf32>
    %c0_31 = arith.constant 0 : index
    %c0_32 = arith.constant 0 : index
    %115 = vector.load %arg6[%c0_31, %c0_32] : memref<8x1xf32, #tpu.memory_space<vmem>>, vector<8x1xf32>
    %cst_33 = arith.constant 0.000000e+00 : f32
    %116 = vector.broadcast %cst_33 : f32 to vector<8x256xf32>
    %cst_34 = arith.constant 0.000000e+00 : f32
    %117 = vector.broadcast %cst_34 : f32 to vector<8x17xf32>
    %118 = vector.extract_strided_slice %3 {offsets = [0, 0], sizes = [8, 239], strides = [1, 1]} : vector<8x256xf32> to vector<8x239xf32>
    %119 = tpu.concatenate %117, %118 in 1 : vector<8x17xf32>, vector<8x239xf32> -> vector<8x256xf32>
    %cst_35 = arith.constant 0.000000e+00 : f32
    %120 = vector.shape_cast %22 : vector<1x256xi1> to vector<1x256xi1>
    %121 = vector.broadcast %120 : vector<1x256xi1> to vector<8x256xi1>
    %122 = vector.broadcast %cst_35 : f32 to vector<8x256xf32>
    %123 = arith.select %121, %119, %122 : vector<8x256xi1>, vector<8x256xf32>
    %124 = vector.extract_strided_slice %114 {offsets = [0, 0], sizes = [8, 1], strides = [1, 1]} : vector<8x9xf32> to vector<8x1xf32>
    %125 = vector.broadcast %124 : vector<8x1xf32> to vector<8x256xf32>
    %126 = arith.mulf %125, %123 : vector<8x256xf32>
    %127 = arith.addf %116, %126 : vector<8x256xf32>
    %cst_36 = arith.constant 0.000000e+00 : f32
    %128 = vector.broadcast %cst_36 : f32 to vector<8x16xf32>
    %129 = vector.extract_strided_slice %3 {offsets = [0, 0], sizes = [8, 240], strides = [1, 1]} : vector<8x256xf32> to vector<8x240xf32>
    %130 = tpu.concatenate %128, %129 in 1 : vector<8x16xf32>, vector<8x240xf32> -> vector<8x256xf32>
    %131 = vector.extract_strided_slice %114 {offsets = [0, 1], sizes = [8, 1], strides = [1, 1]} : vector<8x9xf32> to vector<8x1xf32>
    %132 = vector.broadcast %131 : vector<8x1xf32> to vector<8x256xf32>
    %133 = arith.mulf %132, %130 : vector<8x256xf32>
    %134 = arith.addf %127, %133 : vector<8x256xf32>
    %cst_37 = arith.constant 0.000000e+00 : f32
    %135 = vector.broadcast %cst_37 : f32 to vector<8x15xf32>
    %136 = vector.extract_strided_slice %3 {offsets = [0, 0], sizes = [8, 241], strides = [1, 1]} : vector<8x256xf32> to vector<8x241xf32>
    %137 = tpu.concatenate %135, %136 in 1 : vector<8x15xf32>, vector<8x241xf32> -> vector<8x256xf32>
    %cst_38 = arith.constant 0.000000e+00 : f32
    %138 = vector.shape_cast %24 : vector<1x256xi1> to vector<1x256xi1>
    %139 = vector.broadcast %138 : vector<1x256xi1> to vector<8x256xi1>
    %140 = vector.broadcast %cst_38 : f32 to vector<8x256xf32>
    %141 = arith.select %139, %137, %140 : vector<8x256xi1>, vector<8x256xf32>
    %142 = vector.extract_strided_slice %114 {offsets = [0, 2], sizes = [8, 1], strides = [1, 1]} : vector<8x9xf32> to vector<8x1xf32>
    %143 = vector.broadcast %142 : vector<8x1xf32> to vector<8x256xf32>
    %144 = arith.mulf %143, %141 : vector<8x256xf32>
    %145 = arith.addf %134, %144 : vector<8x256xf32>
    %cst_39 = arith.constant 0.000000e+00 : f32
    %146 = vector.broadcast %cst_39 : f32 to vector<8x1xf32>
    %147 = vector.extract_strided_slice %3 {offsets = [0, 0], sizes = [8, 255], strides = [1, 1]} : vector<8x256xf32> to vector<8x255xf32>
    %148 = tpu.concatenate %146, %147 in 1 : vector<8x1xf32>, vector<8x255xf32> -> vector<8x256xf32>
    %cst_40 = arith.constant 0.000000e+00 : f32
    %149 = vector.shape_cast %22 : vector<1x256xi1> to vector<1x256xi1>
    %150 = vector.broadcast %149 : vector<1x256xi1> to vector<8x256xi1>
    %151 = vector.broadcast %cst_40 : f32 to vector<8x256xf32>
    %152 = arith.select %150, %148, %151 : vector<8x256xi1>, vector<8x256xf32>
    %153 = vector.extract_strided_slice %114 {offsets = [0, 3], sizes = [8, 1], strides = [1, 1]} : vector<8x9xf32> to vector<8x1xf32>
    %154 = vector.broadcast %153 : vector<8x1xf32> to vector<8x256xf32>
    %155 = arith.mulf %154, %152 : vector<8x256xf32>
    %156 = arith.addf %145, %155 : vector<8x256xf32>
    %157 = vector.extract_strided_slice %114 {offsets = [0, 4], sizes = [8, 1], strides = [1, 1]} : vector<8x9xf32> to vector<8x1xf32>
    %158 = vector.broadcast %157 : vector<8x1xf32> to vector<8x256xf32>
    %159 = arith.mulf %158, %3 : vector<8x256xf32>
    %160 = arith.addf %156, %159 : vector<8x256xf32>
    %161 = vector.extract_strided_slice %3 {offsets = [0, 1], sizes = [8, 255], strides = [1, 1]} : vector<8x256xf32> to vector<8x255xf32>
    %cst_41 = arith.constant 0.000000e+00 : f32
    %162 = vector.broadcast %cst_41 : f32 to vector<8x1xf32>
    %163 = tpu.concatenate %161, %162 in 1 : vector<8x255xf32>, vector<8x1xf32> -> vector<8x256xf32>
    %cst_42 = arith.constant 0.000000e+00 : f32
    %164 = vector.shape_cast %24 : vector<1x256xi1> to vector<1x256xi1>
    %165 = vector.broadcast %164 : vector<1x256xi1> to vector<8x256xi1>
    %166 = vector.broadcast %cst_42 : f32 to vector<8x256xf32>
    %167 = arith.select %165, %163, %166 : vector<8x256xi1>, vector<8x256xf32>
    %168 = vector.extract_strided_slice %114 {offsets = [0, 5], sizes = [8, 1], strides = [1, 1]} : vector<8x9xf32> to vector<8x1xf32>
    %169 = vector.broadcast %168 : vector<8x1xf32> to vector<8x256xf32>
    %170 = arith.mulf %169, %167 : vector<8x256xf32>
    %171 = arith.addf %160, %170 : vector<8x256xf32>
    %172 = vector.extract_strided_slice %3 {offsets = [0, 15], sizes = [8, 241], strides = [1, 1]} : vector<8x256xf32> to vector<8x241xf32>
    %cst_43 = arith.constant 0.000000e+00 : f32
    %173 = vector.broadcast %cst_43 : f32 to vector<8x15xf32>
    %174 = tpu.concatenate %172, %173 in 1 : vector<8x241xf32>, vector<8x15xf32> -> vector<8x256xf32>
    %cst_44 = arith.constant 0.000000e+00 : f32
    %175 = vector.shape_cast %22 : vector<1x256xi1> to vector<1x256xi1>
    %176 = vector.broadcast %175 : vector<1x256xi1> to vector<8x256xi1>
    %177 = vector.broadcast %cst_44 : f32 to vector<8x256xf32>
    %178 = arith.select %176, %174, %177 : vector<8x256xi1>, vector<8x256xf32>
    %179 = vector.extract_strided_slice %114 {offsets = [0, 6], sizes = [8, 1], strides = [1, 1]} : vector<8x9xf32> to vector<8x1xf32>
    %180 = vector.broadcast %179 : vector<8x1xf32> to vector<8x256xf32>
    %181 = arith.mulf %180, %178 : vector<8x256xf32>
    %182 = arith.addf %171, %181 : vector<8x256xf32>
    %183 = vector.extract_strided_slice %3 {offsets = [0, 16], sizes = [8, 240], strides = [1, 1]} : vector<8x256xf32> to vector<8x240xf32>
    %cst_45 = arith.constant 0.000000e+00 : f32
    %184 = vector.broadcast %cst_45 : f32 to vector<8x16xf32>
    %185 = tpu.concatenate %183, %184 in 1 : vector<8x240xf32>, vector<8x16xf32> -> vector<8x256xf32>
    %186 = vector.extract_strided_slice %114 {offsets = [0, 7], sizes = [8, 1], strides = [1, 1]} : vector<8x9xf32> to vector<8x1xf32>
    %187 = vector.broadcast %186 : vector<8x1xf32> to vector<8x256xf32>
    %188 = arith.mulf %187, %185 : vector<8x256xf32>
    %189 = arith.addf %182, %188 : vector<8x256xf32>
    %190 = vector.extract_strided_slice %3 {offsets = [0, 17], sizes = [8, 239], strides = [1, 1]} : vector<8x256xf32> to vector<8x239xf32>
    %cst_46 = arith.constant 0.000000e+00 : f32
    %191 = vector.broadcast %cst_46 : f32 to vector<8x17xf32>
    %192 = tpu.concatenate %190, %191 in 1 : vector<8x239xf32>, vector<8x17xf32> -> vector<8x256xf32>
    %cst_47 = arith.constant 0.000000e+00 : f32
    %193 = vector.shape_cast %24 : vector<1x256xi1> to vector<1x256xi1>
    %194 = vector.broadcast %193 : vector<1x256xi1> to vector<8x256xi1>
    %195 = vector.broadcast %cst_47 : f32 to vector<8x256xf32>
    %196 = arith.select %194, %192, %195 : vector<8x256xi1>, vector<8x256xf32>
    %197 = vector.extract_strided_slice %114 {offsets = [0, 8], sizes = [8, 1], strides = [1, 1]} : vector<8x9xf32> to vector<8x1xf32>
    %198 = vector.broadcast %197 : vector<8x1xf32> to vector<8x256xf32>
    %199 = arith.mulf %198, %196 : vector<8x256xf32>
    %200 = arith.addf %189, %199 : vector<8x256xf32>
    %201 = vector.broadcast %115 : vector<8x1xf32> to vector<8x256xf32>
    %202 = arith.addf %200, %201 : vector<8x256xf32>
    %cst_48 = arith.constant 5.000000e-01 : f32
    %203 = vector.broadcast %cst_48 : f32 to vector<8x256xf32>
    %204 = arith.mulf %203, %113 : vector<8x256xf32>
    %cst_49 = arith.constant 0.707106769 : f32
    %205 = vector.broadcast %cst_49 : f32 to vector<8x256xf32>
    %206 = arith.mulf %113, %205 : vector<8x256xf32>
    %cst_50 = arith.constant 0.000000e+00 : f32
    %207 = vector.broadcast %cst_50 : f32 to vector<8x256xf32>
    %208 = arith.cmpf olt, %206, %207 : vector<8x256xf32>
    %cst_51 = arith.constant -1.000000e+00 : f32
    %cst_52 = arith.constant 1.000000e+00 : f32
    %209 = vector.broadcast %cst_51 : f32 to vector<8x256xf32>
    %210 = vector.broadcast %cst_52 : f32 to vector<8x256xf32>
    %211 = arith.select %208, %209, %210 : vector<8x256xi1>, vector<8x256xf32>
    %212 = math.absf %206 : vector<8x256xf32>
    %cst_53 = arith.constant 0.327591091 : f32
    %213 = vector.broadcast %cst_53 : f32 to vector<8x256xf32>
    %214 = arith.mulf %213, %212 : vector<8x256xf32>
    %cst_54 = arith.constant 1.000000e+00 : f32
    %215 = vector.broadcast %cst_54 : f32 to vector<8x256xf32>
    %216 = arith.addf %215, %214 : vector<8x256xf32>
    %cst_55 = arith.constant 1.000000e+00 : f32
    %217 = vector.broadcast %cst_55 : f32 to vector<8x256xf32>
    %218 = arith.divf %217, %216 : vector<8x256xf32>
    %cst_56 = arith.constant 1.06140542 : f32
    %219 = vector.broadcast %cst_56 : f32 to vector<8x256xf32>
    %220 = arith.mulf %219, %218 : vector<8x256xf32>
    %cst_57 = arith.constant -1.45315206 : f32
    %221 = vector.broadcast %cst_57 : f32 to vector<8x256xf32>
    %222 = arith.addf %220, %221 : vector<8x256xf32>
    %223 = arith.mulf %222, %218 : vector<8x256xf32>
    %cst_58 = arith.constant 1.42141378 : f32
    %224 = vector.broadcast %cst_58 : f32 to vector<8x256xf32>
    %225 = arith.addf %223, %224 : vector<8x256xf32>
    %226 = arith.mulf %225, %218 : vector<8x256xf32>
    %cst_59 = arith.constant -0.284496725 : f32
    %227 = vector.broadcast %cst_59 : f32 to vector<8x256xf32>
    %228 = arith.addf %226, %227 : vector<8x256xf32>
    %229 = arith.mulf %228, %218 : vector<8x256xf32>
    %cst_60 = arith.constant 0.254829586 : f32
    %230 = vector.broadcast %cst_60 : f32 to vector<8x256xf32>
    %231 = arith.addf %229, %230 : vector<8x256xf32>
    %232 = arith.mulf %231, %218 : vector<8x256xf32>
    %cst_61 = arith.constant 0.000000e+00 : f32
    %233 = vector.broadcast %cst_61 : f32 to vector<8x256xf32>
    %234 = arith.subf %233, %212 : vector<8x256xf32>
    %235 = arith.mulf %234, %212 : vector<8x256xf32>
    %236 = math.exp %235 : vector<8x256xf32>
    %237 = arith.mulf %232, %236 : vector<8x256xf32>
    %cst_62 = arith.constant 1.000000e+00 : f32
    %238 = vector.broadcast %cst_62 : f32 to vector<8x256xf32>
    %239 = arith.subf %238, %237 : vector<8x256xf32>
    %240 = arith.mulf %211, %239 : vector<8x256xf32>
    %cst_63 = arith.constant 1.000000e+00 : f32
    %241 = vector.broadcast %cst_63 : f32 to vector<8x256xf32>
    %242 = arith.addf %241, %240 : vector<8x256xf32>
    %243 = arith.mulf %204, %242 : vector<8x256xf32>
    %244 = arith.mulf %243, %202 : vector<8x256xf32>
    %c0_64 = arith.constant 0 : index
    %c0_65 = arith.constant 0 : index
    %245 = vector.load %arg7[%c0_64, %c0_65] : memref<4x8xf32, #tpu.memory_space<vmem>>, vector<4x8xf32>
    %c0_66 = arith.constant 0 : index
    %c0_67 = arith.constant 0 : index
    %246 = vector.load %arg8[%c0_66, %c0_67] : memref<4x1xf32, #tpu.memory_space<vmem>>, vector<4x1xf32>
    %cst_68 = arith.constant dense<0.000000e+00> : vector<4x256xf32>
    %247 = tpu.matmul %245, %244, %cst_68 {dimension_numbers = #tpu.dot_dimension_numbers<[1], [0], [0], [1], [0, 0, 1, 1], [], []>} : vector<4x8xf32>, vector<8x256xf32>, vector<4x256xf32> -> vector<4x256xf32>
    %248 = vector.broadcast %246 : vector<4x1xf32> to vector<4x256xf32>
    %249 = arith.addf %247, %248 : vector<4x256xf32>
    %c0_69 = arith.constant 0 : index
    %c0_70 = arith.constant 0 : index
    %c0_71 = arith.constant 0 : index
    %250 = vector.load %arg9[%c0_69, %c0_70, %c0_71] : memref<1x4x256xf32, #tpu.memory_space<vmem>>, vector<1x4x256xf32>
    %251 = vector.shape_cast %250 : vector<1x4x256xf32> to vector<4x256xf32>
    %252 = vector.shape_cast %249 : vector<4x256xf32> to vector<1x4x256xf32>
    tpu.vector_store %arg9[%c0_69, %c0_70, %c0_71], %252 {strides = array<i32>} : memref<1x4x256xf32, #tpu.memory_space<vmem>>, vector<1x4x256xf32>,
    return
  }
  func.func @transform_0(%arg0: i32) -> (i32, i32, i32, i32) {
    %c0_i32 = arith.constant 0 : i32
    %c0_i32_0 = arith.constant 0 : i32
    %c0_i32_1 = arith.constant 0 : i32
    %c0_i32_2 = arith.constant 0 : i32
    return %arg0, %c0_i32, %c0_i32_0, %c0_i32_1 : i32, i32, i32, i32
  }
  func.func @transform_1(%arg0: i32) -> (i32, i32, i32, i32) {
    %c1_i32 = arith.constant 1 : i32
    %c0_i32 = arith.constant 0 : i32
    %c0_i32_0 = arith.constant 0 : i32
    %c0_i32_1 = arith.constant 0 : i32
    return %arg0, %c1_i32, %c0_i32, %c0_i32_0 : i32, i32, i32, i32
  }
  func.func @transform_2(%arg0: i32) -> (i32, i32) {
    %c0_i32 = arith.constant 0 : i32
    %c0_i32_0 = arith.constant 0 : i32
    %c0_i32_1 = arith.constant 0 : i32
    return %c0_i32, %c0_i32_0 : i32, i32
  }
  func.func @transform_3(%arg0: i32) -> (i32, i32) {
    %c0_i32 = arith.constant 0 : i32
    %c0_i32_0 = arith.constant 0 : i32
    %c0_i32_1 = arith.constant 0 : i32
    return %c0_i32, %c0_i32_0 : i32, i32
  }
  func.func @transform_4(%arg0: i32) -> (i32, i32) {
    %c0_i32 = arith.constant 0 : i32
    %c0_i32_0 = arith.constant 0 : i32
    %c0_i32_1 = arith.constant 0 : i32
    return %c0_i32, %c0_i32_0 : i32, i32
  }
  func.func @transform_5(%arg0: i32) -> (i32, i32) {
    %c0_i32 = arith.constant 0 : i32
    %c0_i32_0 = arith.constant 0 : i32
    %c0_i32_1 = arith.constant 0 : i32
    return %c0_i32, %c0_i32_0 : i32, i32
  }
  func.func @transform_6(%arg0: i32) -> (i32, i32) {
    %c0_i32 = arith.constant 0 : i32
    %c0_i32_0 = arith.constant 0 : i32
    %c0_i32_1 = arith.constant 0 : i32
    return %c0_i32, %c0_i32_0 : i32, i32
  }
  func.func @transform_7(%arg0: i32) -> (i32, i32) {
    %c0_i32 = arith.constant 0 : i32
    %c0_i32_0 = arith.constant 0 : i32
    %c0_i32_1 = arith.constant 0 : i32
    return %c0_i32, %c0_i32_0 : i32, i32
  }
  func.func @transform_8(%arg0: i32) -> (i32, i32, i32) {
    %c0_i32 = arith.constant 0 : i32
    %c0_i32_0 = arith.constant 0 : i32
    %c0_i32_1 = arith.constant 0 : i32
    return %arg0, %c0_i32, %c0_i32_0 : i32, i32, i32
  }
}

</mosaic_0001>

<bundles_post_ra>
// kernel: reverse.1
= control target key start
LH: loop header
LB: loop body
LE: loop exit
PB: predicated region body
PF: predicated region fallthrough
CT: control target
= control target key end

     0   :  { %s584_s0 = inlined_call_operand.vmem [shape: f32[16,64,8,3], index: 0, kind: input, shape index: {}]   ;;  %s585_s1 = inlined_call_operand.vmem [shape: f32[16,64,8,3], index: 1, kind: output, shape index: {}]  }
   0x1   :  { %v192_v0 = vld [vmem:[%s584_s0 + $0x10] sm:$0xff]  ;;  %v193_v1 = vld [vmem:[%s584_s0 + $0x28] sm:$0xff]  ;;  %v195_v2 = vld [vmem:[%s584_s0 + $0x40] sm:$0xff] }
   0x2   :  { %4 = vst [vmem:[%s585_s1] sm:$0xff] %v192_v0  ;;  %v197_v3 = vld [vmem:[%s584_s0 + $0x58] sm:$0xff]  ;;  %v199_v4 = vld [vmem:[%s584_s0 + $0x70] sm:$0xff]  ;;  %v201_v5 = vld [vmem:[%s584_s0 + $0x88] sm:$0xff] }
   0x3   :  { %194 = vst [vmem:[%s585_s1 + $0x18] sm:$0xff] %v193_v1  ;;  %v203_v6 = vld [vmem:[%s584_s0 + $0xa0] sm:$0xff]  ;;  %v205_v7 = vld [vmem:[%s584_s0 + $0xb8] sm:$0xff]  ;;  %v207_v8 = vld [vmem:[%s584_s0 + $0xd0] sm:$0xff] }
   0x4   :  { %196 = vst [vmem:[%s585_s1 + $0x30] sm:$0xff] %v195_v2  ;;  %v209_v9 = vld [vmem:[%s584_s0 + $0xe8] sm:$0xff]  ;;  %v211_v10 = vld [vmem:[%s584_s0 + $0x100] sm:$0xff]  ;;  %v213_v11 = vld [vmem:[%s584_s0 + $0x118] sm:$0xff] }
   0x5   :  { %198 = vst [vmem:[%s585_s1 + $0x48] sm:$0xff] %v197_v3  ;;  %v215_v12 = vld [vmem:[%s584_s0 + $0x130] sm:$0xff]  ;;  %v217_v13 = vld [vmem:[%s584_s0 + $0x148] sm:$0xff]  ;;  %v219_v14 = vld [vmem:[%s584_s0 + $0x160] sm:$0xff] }
   0x6   :  { %200 = vst [vmem:[%s585_s1 + $0x60] sm:$0xff] %v199_v4  ;;  %v221_v15 = vld [vmem:[%s584_s0 + $0x178] sm:$0xff]  ;;  %v223_v16 = vld [vmem:[%s584_s0 + $0x8] sm:$0xff]  ;;  %v225_v17 = vld [vmem:[%s584_s0 + $0x20] sm:$0xff] }
   0x7   :  { %202 = vst [vmem:[%s585_s1 + $0x78] sm:$0xff] %v201_v5  ;;  %v227_v18 = vld [vmem:[%s584_s0 + $0x38] sm:$0xff]  ;;  %v229_v19 = vld [vmem:[%s584_s0 + $0x50] sm:$0xff]  ;;  %v231_v20 = vld [vmem:[%s584_s0 + $0x68] sm:$0xff] }
   0x8   :  { %204 = vst [vmem:[%s585_s1 + $0x90] sm:$0xff] %v203_v6  ;;  %v233_v21 = vld [vmem:[%s584_s0 + $0x80] sm:$0xff]  ;;  %v235_v22 = vld [vmem:[%s584_s0 + $0x98] sm:$0xff]  ;;  %v237_v23 = vld [vmem:[%s584_s0 + $0xb0] sm:$0xff] }
   0x9   :  { %206 = vst [vmem:[%s585_s1 + $0xa8] sm:$0xff] %v205_v7  ;;  %v239_v24 = vld [vmem:[%s584_s0 + $0xc8] sm:$0xff]  ;;  %v241_v25 = vld [vmem:[%s584_s0 + $0xe0] sm:$0xff]  ;;  %v243_v26 = vld [vmem:[%s584_s0 + $0xf8] sm:$0xff] }
   0xa   :  { %208 = vst [vmem:[%s585_s1 + $0xc0] sm:$0xff] %v207_v8  ;;  %v245_v27 = vld [vmem:[%s584_s0 + $0x110] sm:$0xff]  ;;  %v247_v28 = vld [vmem:[%s584_s0 + $0x128] sm:$0xff]  ;;  %v249_v29 = vld [vmem:[%s584_s0 + $0x140] sm:$0xff] }
   0xb   :  { %210 = vst [vmem:[%s585_s1 + $0xd8] sm:$0xff] %v209_v9  ;;  %v251_v30 = vld [vmem:[%s584_s0 + $0x158] sm:$0xff]  ;;  %v253_v31 = vld [vmem:[%s584_s0 + $0x170] sm:$0xff]  ;;  %v129_v32 = vld [vmem:[%s584_s0] sm:$0xff] }
   0xc   :  { %212 = vst [vmem:[%s585_s1 + $0xf0] sm:$0xff] %v211_v10  ;;  %v256_v33 = vld [vmem:[%s584_s0 + $0x18] sm:$0xff]  ;;  %v258_v34 = vld [vmem:[%s584_s0 + $0x30] sm:$0xff]  ;;  %v260_v35 = vld [vmem:[%s584_s0 + $0x48] sm:$0xff] }
   0xd   :  { %214 = vst [vmem:[%s585_s1 + $0x108] sm:$0xff] %v213_v11  ;;  %v262_v36 = vld [vmem:[%s584_s0 + $0x60] sm:$0xff]  ;;  %v264_v37 = vld [vmem:[%s584_s0 + $0x78] sm:$0xff]  ;;  %v266_v38 = vld [vmem:[%s584_s0 + $0x90] sm:$0xff] }
   0xe   :  { %216 = vst [vmem:[%s585_s1 + $0x120] sm:$0xff] %v215_v12  ;;  %v268_v39 = vld [vmem:[%s584_s0 + $0xa8] sm:$0xff]  ;;  %v270_v40 = vld [vmem:[%s584_s0 + $0xc0] sm:$0xff]  ;;  %v272_v41 = vld [vmem:[%s584_s0 + $0xd8] sm:$0xff] }
   0xf   :  { %218 = vst [vmem:[%s585_s1 + $0x138] sm:$0xff] %v217_v13  ;;  %v274_v42 = vld [vmem:[%s584_s0 + $0xf0] sm:$0xff]  ;;  %v276_v43 = vld [vmem:[%s584_s0 + $0x108] sm:$0xff]  ;;  %v278_v44 = vld [vmem:[%s584_s0 + $0x120] sm:$0xff] }
  0x10   :  { %220 = vst [vmem:[%s585_s1 + $0x150] sm:$0xff] %v219_v14  ;;  %v280_v45 = vld [vmem:[%s584_s0 + $0x138] sm:$0xff]  ;;  %v282_v46 = vld [vmem:[%s584_s0 + $0x150] sm:$0xff]  ;;  %v284_v47 = vld [vmem:[%s584_s0 + $0x168] sm:$0xff] }
  0x11   :  { %222 = vst [vmem:[%s585_s1 + $0x168] sm:$0xff] %v221_v15 }
  0x12   :  { %224 = vst [vmem:[%s585_s1 + $0x8] sm:$0xff] %v223_v16 }
  0x13   :  { %226 = vst [vmem:[%s585_s1 + $0x20] sm:$0xff] %v225_v17 }
  0x14   :  { %228 = vst [vmem:[%s585_s1 + $0x38] sm:$0xff] %v227_v18 }
  0x15   :  { %230 = vst [vmem:[%s585_s1 + $0x50] sm:$0xff] %v229_v19 }
  0x16   :  { %232 = vst [vmem:[%s585_s1 + $0x68] sm:$0xff] %v231_v20 }
  0x17   :  { %234 = vst [vmem:[%s585_s1 + $0x80] sm:$0xff] %v233_v21 }
  0x18   :  { %236 = vst [vmem:[%s585_s1 + $0x98] sm:$0xff] %v235_v22 }
  0x19   :  { %238 = vst [vmem:[%s585_s1 + $0xb0] sm:$0xff] %v237_v23 }
  0x1a   :  { %240 = vst [vmem:[%s585_s1 + $0xc8] sm:$0xff] %v239_v24 }
  0x1b   :  { %242 = vst [vmem:[%s585_s1 + $0xe0] sm:$0xff] %v241_v25 }
  0x1c   :  { %244 = vst [vmem:[%s585_s1 + $0xf8] sm:$0xff] %v243_v26 }
  0x1d   :  { %246 = vst [vmem:[%s585_s1 + $0x110] sm:$0xff] %v245_v27 }
  0x1e   :  { %248 = vst [vmem:[%s585_s1 + $0x128] sm:$0xff] %v247_v28 }
  0x1f   :  { %250 = vst [vmem:[%s585_s1 + $0x140] sm:$0xff] %v249_v29 }
  0x20   :  { %252 = vst [vmem:[%s585_s1 + $0x158] sm:$0xff] %v251_v30 }
  0x21   :  { %254 = vst [vmem:[%s585_s1 + $0x170] sm:$0xff] %v253_v31 }
  0x22   :  { %255 = vst [vmem:[%s585_s1 + $0x10] sm:$0xff] %v129_v32 }
  0x23   :  { %257 = vst [vmem:[%s585_s1 + $0x28] sm:$0xff] %v256_v33 }
  0x24   :  { %259 = vst [vmem:[%s585_s1 + $0x40] sm:$0xff] %v258_v34 }
  0x25   :  { %261 = vst [vmem:[%s585_s1 + $0x58] sm:$0xff] %v260_v35 }
  0x26   :  { %263 = vst [vmem:[%s585_s1 + $0x70] sm:$0xff] %v262_v36 }
  0x27   :  { %265 = vst [vmem:[%s585_s1 + $0x88] sm:$0xff] %v264_v37 }
  0x28   :  { %267 = vst [vmem:[%s585_s1 + $0xa0] sm:$0xff] %v266_v38 }
  0x29   :  { %269 = vst [vmem:[%s585_s1 + $0xb8] sm:$0xff] %v268_v39 }
  0x2a   :  { %271 = vst [vmem:[%s585_s1 + $0xd0] sm:$0xff] %v270_v40 }
  0x2b   :  { %273 = vst [vmem:[%s585_s1 + $0xe8] sm:$0xff] %v272_v41 }
  0x2c   :  { %275 = vst [vmem:[%s585_s1 + $0x100] sm:$0xff] %v274_v42 }
  0x2d   :  { %277 = vst [vmem:[%s585_s1 + $0x118] sm:$0xff] %v276_v43 }
  0x2e   :  { %279 = vst [vmem:[%s585_s1 + $0x130] sm:$0xff] %v278_v44 }
  0x2f   :  { %281 = vst [vmem:[%s585_s1 + $0x148] sm:$0xff] %v280_v45 }
  0x30   :  { %283 = vst [vmem:[%s585_s1 + $0x160] sm:$0xff] %v282_v46 }
  0x31   :  { %285 = vst [vmem:[%s585_s1 + $0x178] sm:$0xff] %v284_v47 }

// kernel: dffn_forward.3
= control target key start
LH: loop header
LB: loop body
LE: loop exit
PB: predicated region body
PF: predicated region fallthrough
CT: control target
= control target key end

     0   :  { %s470_s12 = smov 0   ;;  %s472_s13 = smov 0   ;;  %s515_s0 = inlined_call_operand.vmem [shape: f32[2,4,256], index: 0, kind: input, shape index: {}]   ;;  %s516_s1 = inlined_call_operand.vmem [shape: f32[16,4], index: 1, kind: input, shape index: {}]   ;;  %s517_s2 = inlined_call_operand.vmem [shape: f32[16,1], index: 2, kind: input, shape index: {}]   ;;  %s518_s3 = inlined_call_operand.vmem [shape: f32[2,16,256], index: 3, kind: output, shape index: {}]  }
   0x1   :  { %s474_s14 = smov 0  }
   0x2 LB: > { %s25_s15 = sadd.s32 1, %s443_s13  ;;  %p382_p0 = scmp.ge.s32.totalorder %s447_s14, 1  ;;  %s447_s14 = sphi %s474_s14, %s13_s14   ;;  %s443_s13 = sphi %s472_s13, %s520_s13   ;;  %s439_s12 = sphi %s470_s12, %s519_s12  }
   0x3   : > { %p27_p1 = scmp.ge.s32.totalorder %s25_s15, 2  ;;  %p158_p2 = scmp.lt.s32.totalorder %s447_s14, 3 }
   0x5   : > { %s522_s15 = smov (%p27_p1, %s25_s15), 0  ;;  %p159_p3 = pnand %p382_p0, %p158_p2 }
   0x6   : > { %p191_p4 = scmp.lt.s32.totalorder (!%p159_p3), %s439_s12, 1 }
   0x7   : > { %162 = sbr.rel (%p159_p3) target bundleno = 162 (0xa2), region = 32 }
   0xc   : > { %v449_v0 = vmov 0   ;;  %v213_v1 = vld [vmem:[%s517_s2] sm:$0xff]  ;;  %s524_s12 = smov (!%p191_p4, %s439_s12), 1  ;;  %v214_v3 = vld [vmem:[%s517_s2 + $0x8] sm:$0xff]  ;;  %vm236_vm0 = vcmask 1043456   ;;  %vm229_vm1 = vcmask 31744  }
   0xd   : > { %424 = vset.pattern.permute.xlu0 %v449_v0  ;;  %s395_s18 = sshll.u32 %s524_s12, 3  ;;  %v211_v4 = vld [vmem:[%s516_s1] sm:$0xff]  ;;  %v212_v5 = vld [vmem:[%s516_s1 + $0x8] sm:$0xff]  ;;  %s396_s28 = sshll.u32 %s524_s12, 5 }
   0xe   : > { %217 = vperm.xlu0 %424, %v213_v1   ;;  %s198_s21 = scalar_lea.vmem %s515_s0, %s395_s18  ;;  %s208_s4 = scalar_lea.vmem %s518_s3, %s396_s28 }
   0xf   : > { %v210_v2 = vld [vmem:[%s198_s21] sm:$0xff] }
  0x10   : > { %226 = vst [vmem:[#allocation1] ss:$2 sm:$0xff] %v210_v2 }
  0x16   : > { %222 = vperm.xlu0 %424, %v214_v3  }
  0x17   : > { %v227_v6 = vld.sshfl [vmem:[#allocation1] sm:$0xff pattern:$0x75316420]  ;;  %v228_v7 = vld.sshfl [vmem:[#allocation1 + $0x8] sm:$0xff pattern:$0x75316420] }
  0x18   : > { %387 = vmatpush.msk.msra.mxu0 %vm236_vm0, %v227_v6  ;;  %397 = vmatpush.msk.msra.mxu2 %vm236_vm0, %v227_v6 }
  0x19   : > { %390 = vmatpush.msk.msra.mxu1 %vm236_vm0, %v228_v7  ;;  %398 = vmatpush.msk.msra.mxu3 %vm236_vm0, %v228_v7 }
  0x1a   : > { %388 = vmatmul.msk.f32.vlgmr.msra.gmra.mxu0 %vm229_vm1, %v211_v4  ;;  %389 = vmatmul.msk.f32.vlgmr.msra.gmra.mxu2 %vm229_vm1, %v212_v5 }
  0x1b   : > { %391 = vmatmul.msk.f32.vlgmr.msra.gmra.mxu1 %vm229_vm1, %v211_v4  ;;  %392 = vmatmul.msk.f32.vlgmr.msra.gmra.mxu3 %vm229_vm1, %v212_v5 }
  0x80   : > { %v218_v8 = vpop.permute.xlu0 %217 }
  0x88   : > { %v223_v13 = vpop.permute.xlu0 %222 }
  0x97   : > { %v258_v9 = vpop.f32.mrf.mxu0 }
  0x98   : > { %v259_v10 = vadd.f32 %v258_v9, %v218_v8  ;;  %v281_v11 = vpop.f32.mrf.mxu1 }
  0x99   : > { %v282_v12 = vadd.f32 %v281_v11, %v218_v8 }
  0x9a   : > { %287 = vst [vmem:[%s208_s4] sm:$0xff] %v259_v10 }
  0x9b   : > { %288 = vst [vmem:[%s208_s4 + $0x8] sm:$0xff] %v282_v12 }
  0x9d   : > { %v261_v14 = vpop.f32.mrf.mxu2 }
  0x9e   : > { %v262_v15 = vadd.f32 %v261_v14, %v223_v13  ;;  %v284_v16 = vpop.f32.mrf.mxu3 }
  0x9f   : > { %v285_v17 = vadd.f32 %v284_v16, %v223_v13 }
  0xa0   : > { %289 = vst [vmem:[%s208_s4 + $0x10] sm:$0xff] %v262_v15 }
  0xa1   : > { %290 = vst [vmem:[%s208_s4 + $0x18] sm:$0xff] %v285_v17 }
  0xa2 PF: > { %s13_s14 = sadd.s32 1, %s447_s14   ;;  %s519_s12 = smov %s443_s13 }
  0xa3   : > { %p10_p5 = scmp.ge.s32.totalorder %s13_s14, 4   ;;  %s520_s13 = smov %s522_s15 }
  0xa5   :  { %12 = sbr.rel (!%p10_p5) target bundleno = 2 (0x2), region = 62 }

// kernel: dffn_forward.4
= control target key start
LH: loop header
LB: loop body
LE: loop exit
PB: predicated region body
PF: predicated region fallthrough
CT: control target
= control target key end

     0   :  { %s880_s9 = smov 0   ;;  %s882_s10 = smov 0   ;;  %s1378_s0 = inlined_call_operand.vmem [shape: f32[2,16,4,64], index: 0, kind: input, shape index: {}]   ;;  %s1379_s1 = inlined_call_operand.vmem [shape: f32[16,64,64], index: 1, kind: input, shape index: {}]   ;;  %s1380_s2 = inlined_call_operand.vmem [shape: f32[2,16,4,64], index: 2, kind: output, shape index: {}]  }
   0x1   :  { %s884_s11 = smov 0  }
   0x2 LB: > { %s24_s12 = sadd.s32 1, %s859_s10  ;;  %p792_p0 = scmp.ge.s32.totalorder %s863_s11, 1  ;;  %s863_s11 = sphi %s884_s11, %s12_s11   ;;  %s859_s10 = sphi %s882_s10, %s1382_s10   ;;  %s855_s9 = sphi %s880_s9, %s1381_s9  }
   0x3   : > { %p26_p1 = scmp.ge.s32.totalorder %s24_s12, 2  ;;  %p131_p2 = scmp.lt.s32.totalorder %s863_s11, 3 }
   0x5   : > { %s1384_s12 = smov (%p26_p1, %s24_s12), 0  ;;  %p132_p3 = pnand %p792_p0, %p131_p2 }
   0x6   : > { %p159_p4 = scmp.lt.s32.totalorder (!%p132_p3), %s855_s9, 1 }
   0x7   : > { %135 = sbr.rel (%p132_p3) target bundleno = 217 (0xd9), region = 28 }
   0xc   : > { %v214_v0 = vld [vmem:[%s1379_s1 + $0xb8] sm:$0xff]  ;;  %v213_v2 = vld [vmem:[%s1379_s1 + $0xb0] sm:$0xff]  ;;  %v212_v4 = vld [vmem:[%s1379_s1 + $0xa8] sm:$0xff]  ;;  %s1386_s9 = smov (!%p159_p4, %s855_s9), 1  ;;  %vm319_vm0 = vcmask 523264   ;;  %vm688_vm1 = vcmask 519168  }
   0xd   : > { %v222_v1 = vld [vmem:[%s1379_s1 + $0xf8] sm:$0xff]  ;;  %377 = vmatpush.msra.mxu2 %v214_v0  ;;  %v221_v3 = vld [vmem:[%s1379_s1 + $0xf0] sm:$0xff]  ;;  %v220_v5 = vld [vmem:[%s1379_s1 + $0xe8] sm:$0xff]  ;;  %s815_s13 = sshll.u32 %s1386_s9, 6 }
   0xe   : > { %400 = vmatpush.msra.mxu3 %v222_v1  ;;  %v198_v6 = vld [vmem:[%s1379_s1 + $0x38] sm:$0xff]  ;;  %v197_v8 = vld [vmem:[%s1379_s1 + $0x30] sm:$0xff]  ;;  %v211_v10 = vld [vmem:[%s1379_s1 + $0xa0] sm:$0xff]  ;;  %s1074_s28 = scalar_lea.vmem %s1378_s0, %s815_s13  ;;  %s1335_s24 = scalar_lea.vmem %s1380_s2, %s815_s13 }
   0xf   : > { %v206_v7 = vld [vmem:[%s1379_s1 + $0x78] sm:$0xff]  ;;  %378 = vmatpush.msra.mxu2 %v213_v2  ;;  %v205_v9 = vld [vmem:[%s1379_s1 + $0x70] sm:$0xff]  ;;  %331 = vmatpush.msra.mxu0 %v198_v6  ;;  %v219_v11 = vld [vmem:[%s1379_s1 + $0xe0] sm:$0xff] }
  0x10   : > { %401 = vmatpush.msra.mxu3 %v221_v3  ;;  %354 = vmatpush.msra.mxu1 %v206_v7  ;;  %v196_v12 = vld [vmem:[%s1379_s1 + $0x28] sm:$0xff]  ;;  %v210_v14 = vld [vmem:[%s1379_s1 + $0x98] sm:$0xff]  ;;  %v195_v16 = vld [vmem:[%s1379_s1 + $0x20] sm:$0xff] }
  0x11   : > { %379 = vmatpush.msra.mxu2 %v212_v4  ;;  %v204_v13 = vld [vmem:[%s1379_s1 + $0x68] sm:$0xff]  ;;  %332 = vmatpush.msra.mxu0 %v197_v8  ;;  %v218_v15 = vld [vmem:[%s1379_s1 + $0xd8] sm:$0xff]  ;;  %v203_v17 = vld [vmem:[%s1379_s1 + $0x60] sm:$0xff] }
  0x12   : > { %402 = vmatpush.msra.mxu3 %v220_v5  ;;  %355 = vmatpush.msra.mxu1 %v205_v9  ;;  %v209_v18 = vld [vmem:[%s1379_s1 + $0x90] sm:$0xff]  ;;  %v194_v20 = vld [vmem:[%s1379_s1 + $0x18] sm:$0xff]  ;;  %v208_v22 = vld [vmem:[%s1379_s1 + $0x88] sm:$0xff] }
  0x13   : > { %380 = vmatpush.msra.mxu2 %v211_v10  ;;  %333 = vmatpush.msra.mxu0 %v196_v12  ;;  %v217_v19 = vld [vmem:[%s1379_s1 + $0xd0] sm:$0xff]  ;;  %v202_v21 = vld [vmem:[%s1379_s1 + $0x58] sm:$0xff]  ;;  %v216_v23 = vld [vmem:[%s1379_s1 + $0xc8] sm:$0xff] }
  0x14   : > { %403 = vmatpush.msra.mxu3 %v219_v11  ;;  %356 = vmatpush.msra.mxu1 %v204_v13  ;;  %v193_v24 = vld [vmem:[%s1379_s1 + $0x10] sm:$0xff]  ;;  %v207_v26 = vld [vmem:[%s1379_s1 + $0x80] sm:$0xff]  ;;  %v246_v28 = vld [vmem:[%s1379_s1 + $0x1b8] sm:$0xff] }
  0x15   : > { %381 = vmatpush.msra.mxu2 %v210_v14  ;;  %334 = vmatpush.msra.mxu0 %v195_v16  ;;  %v201_v25 = vld [vmem:[%s1379_s1 + $0x50] sm:$0xff]  ;;  %v215_v27 = vld [vmem:[%s1379_s1 + $0xc0] sm:$0xff]  ;;  %v254_v29 = vld [vmem:[%s1379_s1 + $0x1f8] sm:$0xff] }
  0x16   : > { %404 = vmatpush.msra.mxu3 %v218_v15  ;;  %357 = vmatpush.msra.mxu1 %v203_v17  ;;  %v192_v30 = vld [vmem:[%s1379_s1 + $0x8] sm:$0xff]  ;;  %v245_v32 = vld [vmem:[%s1379_s1 + $0x1b0] sm:$0xff]  ;;  %v191_v34 = vld [vmem:[%s1379_s1] sm:$0xff] }
  0x17   : > { %382 = vmatpush.msra.mxu2 %v209_v18  ;;  %335 = vmatpush.msra.mxu0 %v194_v20  ;;  %v200_v31 = vld [vmem:[%s1379_s1 + $0x48] sm:$0xff]  ;;  %v253_v33 = vld [vmem:[%s1379_s1 + $0x1f0] sm:$0xff]  ;;  %v199_v35 = vld [vmem:[%s1379_s1 + $0x40] sm:$0xff] }
  0x18   : > { %405 = vmatpush.msra.mxu3 %v217_v19  ;;  %358 = vmatpush.msra.mxu1 %v202_v21  ;;  %v244_v36 = vld [vmem:[%s1379_s1 + $0x1a8] sm:$0xff]  ;;  %v230_v38 = vld [vmem:[%s1379_s1 + $0x138] sm:$0xff]  ;;  %v243_v40 = vld [vmem:[%s1379_s1 + $0x1a0] sm:$0xff] }
  0x19   : > { %383 = vmatpush.msra.mxu2 %v208_v22  ;;  %336 = vmatpush.msra.mxu0 %v193_v24  ;;  %v252_v37 = vld [vmem:[%s1379_s1 + $0x1e8] sm:$0xff]  ;;  %v238_v39 = vld [vmem:[%s1379_s1 + $0x178] sm:$0xff]  ;;  %v251_v41 = vld [vmem:[%s1379_s1 + $0x1e0] sm:$0xff] }
  0x1a   : > { %406 = vmatpush.msra.mxu3 %v216_v23  ;;  %359 = vmatpush.msra.mxu1 %v201_v25  ;;  %v229_v42 = vld [vmem:[%s1379_s1 + $0x130] sm:$0xff]  ;;  %v242_v44 = vld [vmem:[%s1379_s1 + $0x198] sm:$0xff]  ;;  %v228_v46 = vld [vmem:[%s1379_s1 + $0x128] sm:$0xff] }
  0x1b   : > { %384 = vmatpush.msra.mxu2 %v207_v26  ;;  %337 = vmatpush.msra.mxu0 %v192_v30  ;;  %v237_v43 = vld [vmem:[%s1379_s1 + $0x170] sm:$0xff]  ;;  %v250_v45 = vld [vmem:[%s1379_s1 + $0x1d8] sm:$0xff]  ;;  %v236_v47 = vld [vmem:[%s1379_s1 + $0x168] sm:$0xff] }
  0x1c   : > { %407 = vmatpush.msra.mxu3 %v215_v27  ;;  %360 = vmatpush.msra.mxu1 %v200_v31  ;;  %v241_v48 = vld [vmem:[%s1379_s1 + $0x190] sm:$0xff]  ;;  %v227_v50 = vld [vmem:[%s1379_s1 + $0x120] sm:$0xff]  ;;  %v240_v52 = vld [vmem:[%s1379_s1 + $0x188] sm:$0xff] }
  0x1d   : > { %469 = vmatpush.msrb.mxu2 %v246_v28  ;;  %338 = vmatpush.msra.mxu0 %v191_v34  ;;  %v249_v49 = vld [vmem:[%s1379_s1 + $0x1d0] sm:$0xff]  ;;  %v235_v51 = vld [vmem:[%s1379_s1 + $0x160] sm:$0xff]  ;;  %v248_v53 = vld [vmem:[%s1379_s1 + $0x1c8] sm:$0xff] }
  0x1e   : > { %492 = vmatpush.msrb.mxu3 %v254_v29  ;;  %361 = vmatpush.msra.mxu1 %v199_v35  ;;  %v226_v54 = vld [vmem:[%s1379_s1 + $0x118] sm:$0xff]  ;;  %v239_v56 = vld [vmem:[%s1379_s1 + $0x180] sm:$0xff]  ;;  %v177_v58 = vld [vmem:[%s1074_s28 + $0x8] sm:$0xf] }
  0x1f   : > { %470 = vmatpush.msrb.mxu2 %v245_v32  ;;  %423 = vmatpush.msrb.mxu0 %v230_v38  ;;  %v234_v55 = vld [vmem:[%s1379_s1 + $0x158] sm:$0xff]  ;;  %v247_v57 = vld [vmem:[%s1379_s1 + $0x1c0] sm:$0xff]  ;;  %v178_v59 = vld [vmem:[%s1074_s28 + $0xc] sm:$0xf] }
  0x20   : > { %493 = vmatpush.msrb.mxu3 %v253_v33  ;;  %446 = vmatpush.msrb.mxu1 %v238_v39  ;;  %v278_v60 = vld [vmem:[%s1379_s1 + $0x2b8] sm:$0xff]  ;;  %v225_v62 = vld [vmem:[%s1379_s1 + $0x110] sm:$0xff]  ;;  %v224_v2 = vld [vmem:[%s1379_s1 + $0x108] sm:$0xff] }
  0x21   : > { %471 = vmatpush.msrb.mxu2 %v244_v36  ;;  %424 = vmatpush.msrb.mxu0 %v229_v42  ;;  %v286_v61 = vld [vmem:[%s1379_s1 + $0x2f8] sm:$0xff]  ;;  %v233_v63 = vld [vmem:[%s1379_s1 + $0x150] sm:$0xff]  ;;  %v232_v3 = vld [vmem:[%s1379_s1 + $0x148] sm:$0xff] }
  0x22   : > { %494 = vmatpush.msrb.mxu3 %v252_v37  ;;  %447 = vmatpush.msrb.mxu1 %v237_v43  ;;  %v277_v0 = vld [vmem:[%s1379_s1 + $0x2b0] sm:$0xff]  ;;  %v276_v4 = vld [vmem:[%s1379_s1 + $0x2a8] sm:$0xff]  ;;  %v223_v6 = vld [vmem:[%s1379_s1 + $0x100] sm:$0xff] }
  0x23   : > { %472 = vmatpush.msrb.mxu2 %v243_v40  ;;  %425 = vmatpush.msrb.mxu0 %v228_v46  ;;  %v285_v1 = vld [vmem:[%s1379_s1 + $0x2f0] sm:$0xff]  ;;  %v284_v5 = vld [vmem:[%s1379_s1 + $0x2e8] sm:$0xff]  ;;  %v231_v7 = vld [vmem:[%s1379_s1 + $0x140] sm:$0xff] }
  0x24   : > { %495 = vmatpush.msrb.mxu3 %v251_v41  ;;  %448 = vmatpush.msrb.mxu1 %v236_v47  ;;  %v175_v8 = vld [vmem:[%s1074_s28] sm:$0xf]  ;;  %v176_v9 = vld [vmem:[%s1074_s28 + $0x4] sm:$0xf]  ;;  %v262_v10 = vld [vmem:[%s1379_s1 + $0x238] sm:$0xff] }
  0x25   : > { %473 = vmatpush.msrb.mxu2 %v242_v44  ;;  %426 = vmatpush.msrb.mxu0 %v227_v50  ;;  %v270_v11 = vld [vmem:[%s1379_s1 + $0x278] sm:$0xff]  ;;  %v275_v12 = vld [vmem:[%s1379_s1 + $0x2a0] sm:$0xff]  ;;  %v261_v14 = vld [vmem:[%s1379_s1 + $0x230] sm:$0xff] }
  0x26   : > { %496 = vmatpush.msrb.mxu3 %v250_v45  ;;  %449 = vmatpush.msrb.mxu1 %v235_v51  ;;  %v283_v13 = vld [vmem:[%s1379_s1 + $0x2e0] sm:$0xff]  ;;  %v269_v15 = vld [vmem:[%s1379_s1 + $0x270] sm:$0xff]  ;;  %v274_v16 = vld [vmem:[%s1379_s1 + $0x298] sm:$0xff] }
  0x27   : > { %474 = vmatpush.msrb.mxu2 %v241_v48  ;;  %427 = vmatpush.msrb.mxu0 %v226_v54  ;;  %v282_v17 = vld [vmem:[%s1379_s1 + $0x2d8] sm:$0xff]  ;;  %v260_v18 = vld [vmem:[%s1379_s1 + $0x228] sm:$0xff]  ;;  %v273_v20 = vld [vmem:[%s1379_s1 + $0x290] sm:$0xff] }
  0x28   : > { %497 = vmatpush.msrb.mxu3 %v249_v49  ;;  %450 = vmatpush.msrb.mxu1 %v234_v55  ;;  %v268_v19 = vld [vmem:[%s1379_s1 + $0x268] sm:$0xff]  ;;  %v281_v21 = vld [vmem:[%s1379_s1 + $0x2d0] sm:$0xff]  ;;  %v259_v22 = vld [vmem:[%s1379_s1 + $0x220] sm:$0xff] }
  0x29   : > { %475 = vmatpush.msrb.mxu2 %v240_v52  ;;  %800 = vmatmul.msk.f32.vlgmr.msra.gmra.mxu3 %vm319_vm0, %v178_v59  ;;  %v267_v23 = vld [vmem:[%s1379_s1 + $0x260] sm:$0xff]  ;;  %v272_v24 = vld [vmem:[%s1379_s1 + $0x288] sm:$0xff]  ;;  %v181_v26 = vld [vmem:[%s1074_s28 + $0x18] sm:$0xf] }
  0x2a   : > { %498 = vmatpush.msrb.mxu3 %v248_v53  ;;  %799 = vmatmul.msk.f32.vlgmr.msra.gmra.mxu2 %vm319_vm0, %v177_v58  ;;  %v280_v25 = vld [vmem:[%s1379_s1 + $0x2c8] sm:$0xff]  ;;  %v182_v27 = vld [vmem:[%s1074_s28 + $0x1c] sm:$0xf]  ;;  %v271_v30 = vld [vmem:[%s1379_s1 + $0x280] sm:$0xff] }
  0x2b   : > { %476 = vmatpush.msrb.mxu2 %v239_v56  ;;  %428 = vmatpush.msrb.mxu0 %v225_v62  ;;  %v258_v28 = vld [vmem:[%s1379_s1 + $0x218] sm:$0xff]  ;;  %v279_v31 = vld [vmem:[%s1379_s1 + $0x2c0] sm:$0xff]  ;;  %v257_v34 = vld [vmem:[%s1379_s1 + $0x210] sm:$0xff] }
  0x2c   : > { %499 = vmatpush.msrb.mxu3 %v247_v57  ;;  %451 = vmatpush.msrb.mxu1 %v233_v63  ;;  %v266_v29 = vld [vmem:[%s1379_s1 + $0x258] sm:$0xff]  ;;  %v265_v35 = vld [vmem:[%s1379_s1 + $0x250] sm:$0xff]  ;;  %v256_v38 = vld [vmem:[%s1379_s1 + $0x208] sm:$0xff] }
  0x2d   : > { %561 = vmatpush.msra.mxu2 %v278_v60  ;;  %429 = vmatpush.msrb.mxu0 %v224_v2  ;;  %v310_v32 = vld [vmem:[%s1379_s1 + $0x3b8] sm:$0xff]  ;;  %v309_v36 = vld [vmem:[%s1379_s1 + $0x3b0] sm:$0xff]  ;;  %v264_v39 = vld [vmem:[%s1379_s1 + $0x248] sm:$0xff] }
  0x2e   : > { %584 = vmatpush.msra.mxu3 %v286_v61  ;;  %452 = vmatpush.msrb.mxu1 %v232_v3  ;;  %v318_v33 = vld [vmem:[%s1379_s1 + $0x3f8] sm:$0xff]  ;;  %v317_v37 = vld [vmem:[%s1379_s1 + $0x3f0] sm:$0xff]  ;;  %v308_v40 = vld [vmem:[%s1379_s1 + $0x3a8] sm:$0xff] }
  0x2f   : > { %562 = vmatpush.msra.mxu2 %v277_v0  ;;  %430 = vmatpush.msrb.mxu0 %v223_v6  ;;  %v316_v41 = vld [vmem:[%s1379_s1 + $0x3e8] sm:$0xff]  ;;  %v179_v42 = vld [vmem:[%s1074_s28 + $0x10] sm:$0xf]  ;;  %v180_v43 = vld [vmem:[%s1074_s28 + $0x14] sm:$0xf] }
  0x30   : > { %585 = vmatpush.msra.mxu3 %v285_v1  ;;  %453 = vmatpush.msrb.mxu1 %v231_v7  ;;  %v255_v44 = vld [vmem:[%s1379_s1 + $0x200] sm:$0xff]  ;;  %v294_v46 = vld [vmem:[%s1379_s1 + $0x338] sm:$0xff]  ;;  %v185_v50 = vld [vmem:[%s1074_s28 + $0x28] sm:$0xf] }
  0x31   : > { %563 = vmatpush.msra.mxu2 %v276_v4  ;;  %797 = vmatmul.msk.f32.vlgmr.msra.gmra.mxu0 %vm319_vm0, %v175_v8  ;;  %v263_v45 = vld [vmem:[%s1379_s1 + $0x240] sm:$0xff]  ;;  %v302_v47 = vld [vmem:[%s1379_s1 + $0x378] sm:$0xff]  ;;  %v186_v51 = vld [vmem:[%s1074_s28 + $0x2c] sm:$0xf] }
  0x32   : > { %586 = vmatpush.msra.mxu3 %v284_v5  ;;  %798 = vmatmul.msk.f32.vlgmr.msra.gmra.mxu1 %vm319_vm0, %v176_v9  ;;  %v307_v48 = vld [vmem:[%s1379_s1 + $0x3a0] sm:$0xff]  ;;  %v293_v52 = vld [vmem:[%s1379_s1 + $0x330] sm:$0xff]  ;;  %v306_v54 = vld [vmem:[%s1379_s1 + $0x398] sm:$0xff] }
  0x33   : > { %515 = vmatpush.msra.mxu0 %v262_v10  ;;  %538 = vmatpush.msra.mxu1 %v270_v11  ;;  %v315_v49 = vld [vmem:[%s1379_s1 + $0x3e0] sm:$0xff]  ;;  %v301_v53 = vld [vmem:[%s1379_s1 + $0x370] sm:$0xff]  ;;  %v314_v55 = vld [vmem:[%s1379_s1 + $0x3d8] sm:$0xff] }
  0x34   : > { %564 = vmatpush.msra.mxu2 %v275_v12  ;;  %587 = vmatpush.msra.mxu3 %v283_v13  ;;  %v292_v56 = vld [vmem:[%s1379_s1 + $0x328] sm:$0xff]  ;;  %v305_v58 = vld [vmem:[%s1379_s1 + $0x390] sm:$0xff]  ;;  %v291_v60 = vld [vmem:[%s1379_s1 + $0x320] sm:$0xff] }
  0x35   : > { %516 = vmatpush.msra.mxu0 %v261_v14  ;;  %539 = vmatpush.msra.mxu1 %v269_v15  ;;  %v300_v57 = vld [vmem:[%s1379_s1 + $0x368] sm:$0xff]  ;;  %v313_v59 = vld [vmem:[%s1379_s1 + $0x3d0] sm:$0xff]  ;;  %v299_v61 = vld [vmem:[%s1379_s1 + $0x360] sm:$0xff] }
  0x36   : > { %565 = vmatpush.msra.mxu2 %v274_v16  ;;  %588 = vmatpush.msra.mxu3 %v282_v17  ;;  %v304_v62 = vld [vmem:[%s1379_s1 + $0x388] sm:$0xff]  ;;  %v183_v0 = vld [vmem:[%s1074_s28 + $0x20] sm:$0xf]  ;;  %v184_v1 = vld [vmem:[%s1074_s28 + $0x24] sm:$0xf] }
  0x37   : > { %517 = vmatpush.msra.mxu0 %v260_v18  ;;  %540 = vmatpush.msra.mxu1 %v268_v19  ;;  %v312_v63 = vld [vmem:[%s1379_s1 + $0x3c8] sm:$0xff]  ;;  %v290_v2 = vld [vmem:[%s1379_s1 + $0x318] sm:$0xff]  ;;  %v303_v4 = vld [vmem:[%s1379_s1 + $0x380] sm:$0xff] }
  0x38   : > { %566 = vmatpush.msra.mxu2 %v273_v20  ;;  %589 = vmatpush.msra.mxu3 %v281_v21  ;;  %v298_v3 = vld [vmem:[%s1379_s1 + $0x358] sm:$0xff]  ;;  %v311_v5 = vld [vmem:[%s1379_s1 + $0x3c0] sm:$0xff]  ;;  %v289_v8 = vld [vmem:[%s1379_s1 + $0x310] sm:$0xff] }
  0x39   : > { %518 = vmatpush.msra.mxu0 %v259_v22  ;;  %541 = vmatpush.msra.mxu1 %v267_v23  ;;  %v189_v6 = vld [vmem:[%s1074_s28 + $0x38] sm:$0xf]  ;;  %v190_v7 = vld [vmem:[%s1074_s28 + $0x3c] sm:$0xf]  ;;  %v297_v9 = vld [vmem:[%s1379_s1 + $0x350] sm:$0xff] }
  0x3a   : > { %567 = vmatpush.msra.mxu2 %v272_v24  ;;  %590 = vmatpush.msra.mxu3 %v280_v25  ;;  %v288_v10 = vld [vmem:[%s1379_s1 + $0x308] sm:$0xff]  ;;  %v287_v12 = vld [vmem:[%s1379_s1 + $0x300] sm:$0xff]  ;;  %v187_v14 = vld [vmem:[%s1074_s28 + $0x30] sm:$0xf] }
  0x3b   : > { %803 = vmatmul.msk.f32.vlgmr.msrb.gmra.mxu2 %vm319_vm0, %v181_v26  ;;  %804 = vmatmul.msk.f32.vlgmr.msrb.gmra.mxu3 %vm319_vm0, %v182_v27  ;;  %v296_v11 = vld [vmem:[%s1379_s1 + $0x348] sm:$0xff]  ;;  %v295_v13 = vld [vmem:[%s1379_s1 + $0x340] sm:$0xff]  ;;  %v188_v15 = vld [vmem:[%s1074_s28 + $0x34] sm:$0xf] }
  0x3c   : > { %519 = vmatpush.msra.mxu0 %v258_v28  ;;  %542 = vmatpush.msra.mxu1 %v266_v29 }
  0x3d   : > { %568 = vmatpush.msra.mxu2 %v271_v30  ;;  %591 = vmatpush.msra.mxu3 %v279_v31 }
  0x3e   : > { %520 = vmatpush.msra.mxu0 %v257_v34  ;;  %543 = vmatpush.msra.mxu1 %v265_v35 }
  0x3f   : > { %653 = vmatpush.msrb.mxu2 %v310_v32  ;;  %676 = vmatpush.msrb.mxu3 %v318_v33 }
  0x40   : > { %521 = vmatpush.msra.mxu0 %v256_v38  ;;  %544 = vmatpush.msra.mxu1 %v264_v39 }
  0x41   : > { %654 = vmatpush.msrb.mxu2 %v309_v36  ;;  %677 = vmatpush.msrb.mxu3 %v317_v37 }
  0x42   : > { %801 = vmatmul.msk.f32.vlgmr.msrb.gmra.mxu0 %vm319_vm0, %v179_v42  ;;  %802 = vmatmul.msk.f32.vlgmr.msrb.gmra.mxu1 %vm319_vm0, %v180_v43 }
  0x43   : > { %655 = vmatpush.msrb.mxu2 %v308_v40  ;;  %678 = vmatpush.msrb.mxu3 %v316_v41 }
  0x44   : > { %522 = vmatpush.msra.mxu0 %v255_v44  ;;  %545 = vmatpush.msra.mxu1 %v263_v45 }
  0x45   : > { %656 = vmatpush.msrb.mxu2 %v307_v48  ;;  %679 = vmatpush.msrb.mxu3 %v315_v49 }
  0x46   : > { %607 = vmatpush.msrb.mxu0 %v294_v46  ;;  %630 = vmatpush.msrb.mxu1 %v302_v47 }
  0x47   : > { %807 = vmatmul.msk.f32.vlgmr.msra.gmra.mxu2 %vm319_vm0, %v185_v50  ;;  %808 = vmatmul.msk.f32.vlgmr.msra.gmra.mxu3 %vm319_vm0, %v186_v51 }
  0x48   : > { %608 = vmatpush.msrb.mxu0 %v293_v52  ;;  %631 = vmatpush.msrb.mxu1 %v301_v53 }
  0x49   : > { %657 = vmatpush.msrb.mxu2 %v306_v54  ;;  %680 = vmatpush.msrb.mxu3 %v314_v55 }
  0x4a   : > { %609 = vmatpush.msrb.mxu0 %v292_v56  ;;  %632 = vmatpush.msrb.mxu1 %v300_v57 }
  0x4b   : > { %658 = vmatpush.msrb.mxu2 %v305_v58  ;;  %681 = vmatpush.msrb.mxu3 %v313_v59 }
  0x4c   : > { %610 = vmatpush.msrb.mxu0 %v291_v60  ;;  %633 = vmatpush.msrb.mxu1 %v299_v61 }
  0x4d   : > { %659 = vmatpush.msrb.mxu2 %v304_v62  ;;  %682 = vmatpush.msrb.mxu3 %v312_v63 }
  0x4e   : > { %805 = vmatmul.msk.f32.vlgmr.msra.gmra.mxu0 %vm319_vm0, %v183_v0  ;;  %806 = vmatmul.msk.f32.vlgmr.msra.gmra.mxu1 %vm319_vm0, %v184_v1 }
  0x4f   : > { %611 = vmatpush.msrb.mxu0 %v290_v2  ;;  %634 = vmatpush.msrb.mxu1 %v298_v3 }
  0x50   : > { %660 = vmatpush.msrb.mxu2 %v303_v4  ;;  %683 = vmatpush.msrb.mxu3 %v311_v5 }
  0x51   : > { %811 = vmatmul.msk.f32.vlgmr.msrb.gmra.mxu2 %vm319_vm0, %v189_v6  ;;  %812 = vmatmul.msk.f32.vlgmr.msrb.gmra.mxu3 %vm319_vm0, %v190_v7 }
  0x52   : > { %612 = vmatpush.msrb.mxu0 %v289_v8  ;;  %635 = vmatpush.msrb.mxu1 %v297_v9 }
  0x54   : > { %613 = vmatpush.msrb.mxu0 %v288_v10  ;;  %636 = vmatpush.msrb.mxu1 %v296_v11 }
  0x56   : > { %614 = vmatpush.msrb.mxu0 %v287_v12  ;;  %637 = vmatpush.msrb.mxu1 %v295_v13 }
  0x57   : > { %809 = vmatmul.msk.f32.vlgmr.msrb.gmra.mxu0 %vm319_vm0, %v187_v14  ;;  %810 = vmatmul.msk.f32.vlgmr.msrb.gmra.mxu1 %vm319_vm0, %v188_v15 }
  0xac   : > { %v409_v17 = vpop.f32.mrf.mxu3 }
  0xad   : > { %v386_v16 = vpop.f32.mrf.mxu2  ;;  %692 = vst.msk [vmem:[%s1335_s24 + $0xc] sm:$0xf] %vm688_vm1, %v409_v17 }
  0xae   : > { %v340_v18 = vpop.f32.mrf.mxu0  ;;  %691 = vst.msk [vmem:[%s1335_s24 + $0x8] sm:$0xf] %vm688_vm1, %v386_v16 }
  0xaf   : > { %v363_v19 = vpop.f32.mrf.mxu1  ;;  %689 = vst.msk [vmem:[%s1335_s24] sm:$0xf] %vm688_vm1, %v340_v18 }
  0xb0   : > { %690 = vst.msk [vmem:[%s1335_s24 + $0x4] sm:$0xf] %vm688_vm1, %v363_v19 }
  0xbe   : > { %v478_v20 = vpop.f32.mrf.mxu2  ;;  %v501_v21 = vpop.f32.mrf.mxu3 }
  0xbf   : > { %695 = vst.msk [vmem:[%s1335_s24 + $0x18] sm:$0xf] %vm688_vm1, %v478_v20  ;;  %v432_v22 = vpop.f32.mrf.mxu0  ;;  %v455_v23 = vpop.f32.mrf.mxu1 }
  0xc0   : > { %696 = vst.msk [vmem:[%s1335_s24 + $0x1c] sm:$0xf] %vm688_vm1, %v501_v21 }
  0xc1   : > { %693 = vst.msk [vmem:[%s1335_s24 + $0x10] sm:$0xf] %vm688_vm1, %v432_v22 }
  0xc2   : > { %694 = vst.msk [vmem:[%s1335_s24 + $0x14] sm:$0xf] %vm688_vm1, %v455_v23 }
  0xca   : > { %v570_v24 = vpop.f32.mrf.mxu2  ;;  %v593_v25 = vpop.f32.mrf.mxu3 }
  0xcb   : > { %v524_v26 = vpop.f32.mrf.mxu0  ;;  %v547_v27 = vpop.f32.mrf.mxu1  ;;  %699 = vst.msk [vmem:[%s1335_s24 + $0x28] sm:$0xf] %vm688_vm1, %v570_v24 }
  0xcc   : > { %697 = vst.msk [vmem:[%s1335_s24 + $0x20] sm:$0xf] %vm688_vm1, %v524_v26 }
  0xcd   : > { %698 = vst.msk [vmem:[%s1335_s24 + $0x24] sm:$0xf] %vm688_vm1, %v547_v27 }
  0xce   : > { %700 = vst.msk [vmem:[%s1335_s24 + $0x2c] sm:$0xf] %vm688_vm1, %v593_v25 }
  0xd4   : > { %v616_v28 = vpop.f32.mrf.mxu0  ;;  %v639_v29 = vpop.f32.mrf.mxu1 }
  0xd5   : > { %701 = vst.msk [vmem:[%s1335_s24 + $0x30] sm:$0xf] %vm688_vm1, %v616_v28  ;;  %v662_v30 = vpop.f32.mrf.mxu2  ;;  %v685_v31 = vpop.f32.mrf.mxu3 }
  0xd6   : > { %702 = vst.msk [vmem:[%s1335_s24 + $0x34] sm:$0xf] %vm688_vm1, %v639_v29 }
  0xd7   : > { %703 = vst.msk [vmem:[%s1335_s24 + $0x38] sm:$0xf] %vm688_vm1, %v662_v30 }
  0xd8   : > { %704 = vst.msk [vmem:[%s1335_s24 + $0x3c] sm:$0xf] %vm688_vm1, %v685_v31 }
  0xd9 PF: > { %s12_s11 = sadd.s32 1, %s863_s11   ;;  %s1381_s9 = smov %s859_s10 }
  0xda   : > { %p9_p5 = scmp.ge.s32.totalorder %s12_s11, 4   ;;  %s1382_s10 = smov %s1384_s12 }
  0xdc   :  { %11 = sbr.rel (!%p9_p5) target bundleno = 2 (0x2), region = 58 }

// kernel: dffn_forward.5
= control target key start
LH: loop header
LB: loop body
LE: loop exit
PB: predicated region body
PF: predicated region fallthrough
CT: control target
= control target key end

     0   :  { %s1057_s27 = smov 0   ;;  %s1417_s0 = inlined_call_operand.vmem [shape: f32[2,2,8,256], index: 0, kind: input, shape index: {}, may-alias: {0,1}]   ;;  %s1418_s1 = inlined_call_operand.vmem [shape: f32[2,2,8,256], index: 1, kind: input, shape index: {}, may-alias: {0,1}]   ;;  %s1419_s2 = inlined_call_operand.vmem [shape: f32[8,9], index: 2, kind: input, shape index: {}]   ;;  %s1420_s3 = inlined_call_operand.vmem [shape: f32[8,1], index: 3, kind: input, shape index: {}]   ;;  %s1421_s4 = inlined_call_operand.vmem [shape: f32[8,9], index: 4, kind: input, shape index: {}]   ;;  %s1422_s5 = inlined_call_operand.vmem [shape: f32[8,1], index: 5, kind: input, shape index: {}]   ;;  %s1423_s6 = inlined_call_operand.vmem [shape: f32[4,8], index: 6, kind: input, shape index: {}]   ;;  %s1424_s7 = inlined_call_operand.vmem [shape: f32[4,1], index: 7, kind: input, shape index: {}]   ;;  %s1425_s8 = inlined_call_operand.vmem [shape: f32[2,4,256], index: 8, kind: output, shape index: {}]  }
   0x1 LB: > { %s913_s28 = sadd.s32 4294967295, %s992_s27   ;;  %p917_p0 = scmp.ge.s32.totalorder %s992_s27, 1  ;;  %s992_s27 = sphi %s1057_s27, %s18_s27  }
   0x2   : > { %p273_p1 = scmp.lt.s32.totalorder %s992_s27, 3 }
   0x4   : > { %p274_p2 = pnand %p917_p0, %p273_p1 }
   0x5   : > { %p313_p3 = scmp.lt.s32.totalorder (!%p274_p2), %s913_s28, 1  ;;  %s996_s13 = smov (!%p274_p2), 16  }
   0x6   : > { %277 = sbr.rel (%p274_p2) target bundleno = 411 (0x19b), region = 52  ;;  %s997_s14 = smov (!%p274_p2), 17  }
   0x7   : > { %s1001_s15 = smov (!%p274_p2), 15   ;;  %s1003_s16 = smov (!%p274_p2), 1  }
   0x8   : > { %s1004_s17 = smov (!%p274_p2), 127   ;;  %s1005_s18 = smov (!%p274_p2), 113  }
   0x9   : > { %s1008_s19 = smov (!%p274_p2), 112   ;;  %s1010_s22 = smov (!%p274_p2), 111  }
   0xb   : > { %v364_v0 = vld [vmem:[%s1419_s2] sm:$0xff]  ;;  %v994_v1 = vmov 0   ;;  %s1435_s28 = smov (!%p313_p3, %s913_s28), 1  ;;  %v995_v2 = vmov 4   ;;  %v998_v4 = vmov 5   ;;  %v999_v5 = vmov 1  }
   0xc   : > { %959 = vset.pattern.permute.xlu2 %v994_v1  ;;  %963 = vset.pattern.permute.xlu0 %v995_v2  ;;  %s930_s9 = sshll.u32 %s1435_s28, 5  ;;  %v1000_v7 = vmov 2   ;;  %v1002_v8 = vmov 3   ;;  %v1006_v9 = vmov 7   ;;  %v1007_v10 = vmov 8   ;;  %v365_v12 = vld [vmem:[%s1420_s3] sm:$0xff] }
   0xd   : > { %385 = vperm.xlu2 %959, %v364_v0   ;;  %s317_s12 = scalar_lea.vmem %s1417_s0, %s930_s9  ;;  %964 = vset.pattern.permute.xlu1 %v998_v4  ;;  %v1009_v11 = vmov 6   ;;  %v540_v13 = vld [vmem:[%s1421_s4] sm:$0xff]  ;;  %s879_s29 = scalar_lea.vmem %s1418_s1, %s930_s9  ;;  %v333_v18 = vlaneseq  ;;  %vm396_vm0 = vcmask 130048   ;;  %vm372_vm1 = vcmask 138240  }
   0xe   : > { %v1077_v3 = vld [vmem:[%s317_s12] sm:$0xff]  ;;  %v1084_v6 = vld [vmem:[%s317_s12 + $0x8] sm:$0xff]  ;;  %v1127_v14 = vld [vmem:[%s879_s29 + $0x18] sm:$0xff]  ;;  %vm413_vm3 = vcmask 121856   ;;  %vm436_vm5 = vcmask 7168   ;;  %vm463_vm7 = vcmask 1039360  }
   0xf   : > { %392 = vrot.lane.b32.xlu1 %v1077_v3, %s996_s13  ;;  %368 = vrot.lane.b32.xlu0 %v1077_v3, %s997_s14  ;;  %v1129_v15 = vld [vmem:[%s879_s29 + $0x10] sm:$0xff]  ;;  %v1159_v20 = vand.u32 127, %v333_v18  ;;  %v541_v31 = vld [vmem:[%s1422_s5] sm:$0xff]  ;;  %vm482_vm8 = vcmask 924672   ;;  %vm501_vm10 = vcmask 916480   ;;  %vm518_vm11 = vcmask 908288  }
  0x11   : > { %v340_v21 = vand.u32 15, %v1159_v20  ;;  %v335_v42 = vadd.s32 128, %v1159_v20 }
  0x13   : > { %vm1167_vm2 = vcmp.ne.s32.totalorder %v340_v21, 0  ;;  %v347_v44 = vand.u32 15, %v335_v42  ;;  %vm1224_vm9 = vcmp.ne.s32.totalorder %v340_v21, 15 }
  0x15   : > { %960 = vset.pattern.permute.xlu2 %v999_v5  ;;  %vm1201_vm4 = vcmp.ne.s32.totalorder %v347_v44, 0  ;;  %vm1206_vm6 = vcmp.ne.s32.totalorder %v347_v44, 15 }
  0x16   : > { %402 = vperm.xlu2 %960, %v364_v0  }
  0x17   : > { %394 = vrot.lane.b32.xlu1 %v1084_v6, %s996_s13  ;;  %370 = vrot.lane.b32.xlu0 %v1084_v6, %s997_s14 }
  0x1e   : > { %961 = vset.pattern.permute.xlu2 %v1000_v7 }
  0x1f   : > { %425 = vperm.xlu2 %961, %v364_v0   ;;  %411 = vrot.lane.b32.xlu1 %v1084_v6, %s1001_s15 }
  0x20   : > { %409 = vrot.lane.b32.xlu0 %v1077_v3, %s1001_s15 }
  0x27   : > { %962 = vset.pattern.permute.xlu2 %v1002_v8  ;;  %434 = vrot.lane.b32.xlu1 %v1084_v6, %s1003_s16 }
  0x28   : > { %444 = vperm.xlu2 %962, %v364_v0   ;;  %432 = vrot.lane.b32.xlu0 %v1077_v3, %s1003_s16 }
  0x2f   : > { %461 = vrot.lane.b32.xlu1 %v1084_v6, %s1004_s17 }
  0x30   : > { %459 = vrot.lane.b32.xlu2 %v1077_v3, %s1004_s17  ;;  %452 = vperm.xlu0 %963, %v364_v0  }
  0x31   : > { %967 = vset.pattern.permute.xlu2 %v1007_v10 }
  0x37   : > { %471 = vperm.xlu1 %964, %v364_v0  }
  0x38   : > { %480 = vrot.lane.b32.xlu2 %v1084_v6, %s1005_s18  ;;  %478 = vrot.lane.b32.xlu0 %v1077_v3, %s1005_s18 }
  0x39   : > { %966 = vset.pattern.permute.xlu0 %v1006_v9 }
  0x3f   : > { %965 = vset.pattern.permute.xlu1 %v1009_v11 }
  0x40   : > { %499 = vrot.lane.b32.xlu2 %v1084_v6, %s1008_s19  ;;  %507 = vperm.xlu0 %966, %v364_v0  }
  0x41   : > { %490 = vperm.xlu1 %965, %v364_v0  }
  0x48   : > { %497 = vrot.lane.b32.xlu2 %v1077_v3, %s1008_s19  ;;  %968 = vset.pattern.permute.xlu0 %v994_v1 }
  0x49   : > { %516 = vrot.lane.b32.xlu1 %v1084_v6, %s1010_s22  ;;  %535 = vperm.xlu0 %968, %v365_v12  }
  0x4a   : > { %969 = vset.pattern.permute.xlu1 %v999_v5 }
  0x50   : > { %526 = vperm.xlu2 %967, %v364_v0  }
  0x51   : > { %514 = vrot.lane.b32.xlu1 %v1077_v3, %s1010_s22  ;;  %556 = vperm.xlu0 %968, %v540_v13  }
  0x58   : > { %546 = vrot.lane.b32.xlu2 %v1127_v14, %s997_s14 }
  0x59   : > { %972 = vset.pattern.permute.xlu2 %v995_v2  ;;  %544 = vrot.lane.b32.xlu1 %v1129_v15, %s997_s14  ;;  %s932_s14 = sshll.u32 %s1435_s28, 3 }
  0x5a   : > { %581 = vrot.lane.b32.xlu0 %v1127_v14, %s1001_s15 }
  0x60   : > { %565 = vrot.lane.b32.xlu2 %v1127_v14, %s996_s13 }
  0x61   : > { %563 = vrot.lane.b32.xlu1 %v1129_v15, %s996_s13 }
  0x62   : > { %599 = vrot.lane.b32.xlu0 %v1127_v14, %s1003_s16 }
  0x67   : > { %v1143_v16 = vpop.permute.xlu2 %385 }
  0x68   : > { %579 = vrot.lane.b32.xlu2 %v1129_v15, %s1001_s15 }
  0x69   : > { %572 = vperm.xlu1 %969, %v540_v13  }
  0x6a   : > { %625 = vrot.lane.b32.xlu0 %v1127_v14, %s1004_s17 }
  0x70   : > { %597 = vrot.lane.b32.xlu2 %v1129_v15, %s1003_s16  ;;  %v1151_v17 = vpop.permute.xlu2 %402 }
  0x71   : > { %970 = vset.pattern.permute.xlu1 %v1000_v7 }
  0x72   : > { %643 = vrot.lane.b32.xlu0 %v1127_v14, %s1005_s18  ;;  %590 = vperm.xlu1 %970, %v540_v13  }
  0x78   : > { %616 = vperm.xlu2 %972, %v540_v13  }
  0x79   : > { %v1155_v19 = vpop.permute.xlu2 %425 }
  0x7a   : > { %661 = vrot.lane.b32.xlu0 %v1127_v14, %s1008_s19  ;;  %971 = vset.pattern.permute.xlu1 %v1002_v8 }
  0x7b   : > { %608 = vperm.xlu1 %971, %v540_v13  }
  0x80   : > { %973 = vset.pattern.permute.xlu2 %v998_v4 }
  0x81   : > { %634 = vperm.xlu2 %973, %v540_v13   ;;  %v393_v24 = vpop.permute.xlu1 %392  ;;  %v369_v25 = vpop.permute.xlu0 %368 }
  0x82   : > { %v1163_v22 = vpop.permute.xlu2 %444  ;;  %659 = vrot.lane.b32.xlu0 %v1129_v15, %s1008_s19  ;;  %v400_v26 = vsel %vm396_vm0, 0.0, %v393_v24  ;;  %v376_v27 = vsel %vm372_vm1, 0.0, %v369_v25 }
  0x83   : > { %623 = vrot.lane.b32.xlu1 %v1129_v15, %s1004_s17  ;;  %v381_v28 = vsel %vm1167_vm2, %v376_v27, 0.0  ;;  %v405_v29 = vmul.f32 %v1151_v17, %v400_v26  ;;  %s328_s17 = scalar_lea.vmem %s1425_s8, %s932_s14 }
  0x84   : > { %975 = vset.pattern.permute.xlu1 %v1006_v9  ;;  %v388_v30 = vmul.f32 %v1143_v16, %v381_v28 }
  0x86   : > { %v1182_v32 = vadd.f32 %v405_v29, %v388_v30 }
  0x89   : > { %974 = vset.pattern.permute.xlu2 %v1009_v11  ;;  %v395_v34 = vpop.permute.xlu1 %394  ;;  %v371_v35 = vpop.permute.xlu0 %370 }
  0x8a   : > { %652 = vperm.xlu2 %974, %v540_v13   ;;  %v1184_v33 = vpop.permute.xlu2 %459  ;;  %695 = vperm.xlu0 %968, %v541_v31   ;;  %v373_v48 = vsel %vm372_vm1, %v369_v25, %v371_v35  ;;  %v397_v51 = vsel %vm396_vm0, %v393_v24, %v395_v34 }
  0x8b   : > { %641 = vrot.lane.b32.xlu1 %v1129_v15, %s1005_s18  ;;  %v382_v52 = vsel %vm1201_vm4, %v373_v48, 0.0  ;;  %v406_v58 = vmul.f32 %v1151_v17, %v397_v51 }
  0x8c   : > { %v389_v59 = vmul.f32 %v1143_v16, %v382_v52 }
  0x8e   : > { %v408_v0 = vadd.f32 %v406_v58, %v389_v59 }
  0x91   : > { %v412_v37 = vpop.permute.xlu1 %411 }
  0x92   : > { %v1188_v36 = vpop.permute.xlu2 %480  ;;  %677 = vrot.lane.b32.xlu2 %v1127_v14, %s1010_s22  ;;  %v410_v38 = vpop.permute.xlu0 %409 }
  0x93   : > { %976 = vset.pattern.permute.xlu2 %v1007_v10  ;;  %668 = vperm.xlu1 %975, %v540_v13   ;;  %v414_v50 = vsel %vm413_vm3, %v410_v38, %v412_v37  ;;  %v417_v63 = vsel %vm413_vm3, 0.0, %v410_v38  ;;  %v486_v4 = vsel %vm482_vm8, %v1188_v36, 0.0 }
  0x94   : > { %v423_v56 = vsel %vm1206_vm6, %v414_v50, 0.0  ;;  %v422_v5 = vsel %vm1224_vm9, %v417_v63, 0.0  ;;  %v488_v20 = vsel %vm1201_vm4, %v486_v4, 0.0 }
  0x95   : > { %v429_v61 = vmul.f32 %v1155_v19, %v423_v56  ;;  %v428_v17 = vmul.f32 %v1155_v19, %v422_v5 }
  0x97   : > { %v431_v7 = vadd.f32 %v429_v61, %v408_v0  ;;  %v430_v19 = vadd.f32 %v428_v17, %v1182_v32 }
  0x99   : > { %v435_v40 = vpop.permute.xlu1 %434 }
  0x9a   : > { %v1193_v39 = vpop.permute.xlu2 %499  ;;  %686 = vperm.xlu2 %976, %v540_v13   ;;  %v433_v41 = vpop.permute.xlu0 %432 }
  0x9b   : > { %675 = vrot.lane.b32.xlu1 %v1129_v15, %s1010_s22  ;;  %v437_v53 = vsel %vm436_vm5, %v433_v41, %v435_v40  ;;  %v440_v8 = vsel %vm436_vm5, 0.0, %v433_v41  ;;  %v505_v25 = vsel %vm501_vm10, %v1193_v39, 0.0 }
  0x9c   : > { %977 = vset.pattern.permute.xlu1 %v994_v1  ;;  %v442_v60 = vsel %vm1201_vm4, %v437_v53, 0.0  ;;  %v441_v18 = vsel %vm1167_vm2, %v440_v8, 0.0 }
  0x9d   : > { %v448_v1 = vmul.f32 %v1163_v22, %v442_v60  ;;  %v447_v26 = vmul.f32 %v1163_v22, %v441_v18 }
  0x9f   : > { %v450_v13 = vadd.f32 %v448_v1, %v431_v7  ;;  %v449_v22 = vadd.f32 %v447_v26, %v430_v19 }
  0xa1   : > { %v462_v45 = vpop.permute.xlu1 %461 }
  0xa2   : > { %v1199_v43 = vpop.permute.xlu2 %497  ;;  %v453_v46 = vpop.permute.xlu0 %452  ;;  %v467_v2 = vsel %vm463_vm7, %v462_v45, 0.0  ;;  %v464_v27 = vsel %vm463_vm7, %v1184_v33, %v462_v45 }
  0xa3   : > { %v456_v9 = vmul.f32 %v453_v46, %v1084_v6  ;;  %v469_v11 = vsel %vm1206_vm6, %v467_v2, 0.0  ;;  %v455_v29 = vmul.f32 %v453_v46, %v1077_v3  ;;  %v468_v35 = vsel %vm1224_vm9, %v464_v27, 0.0 }
  0xa4   : > { %v502_v45 = vsel %vm501_vm10, %v1199_v43, %v1193_v39 }
  0xa5   : > { %v458_v24 = vadd.f32 %v456_v9, %v450_v13  ;;  %v457_v41 = vadd.f32 %v455_v29, %v449_v22 }
  0xa9   : > { %v472_v54 = vpop.permute.xlu1 %471 }
  0xaa   : > { %v479_v55 = vpop.permute.xlu0 %478  ;;  %v1217_v57 = vpop.permute.xlu2 %526  ;;  %v475_v16 = vmul.f32 %v472_v54, %v469_v11  ;;  %v474_v40 = vmul.f32 %v472_v54, %v468_v35 }
  0xab   : > { %v483_v30 = vsel %vm482_vm8, %v479_v55, %v1188_v36 }
  0xac   : > { %v477_v28 = vadd.f32 %v475_v16, %v458_v24  ;;  %v487_v32 = vsel %vm1167_vm2, %v483_v30, 0.0  ;;  %v476_v48 = vadd.f32 %v474_v40, %v457_v41 }
  0xb2   : > { %v508_v10 = vpop.permute.xlu0 %507  ;;  %v1244_v21 = vpop.permute.xlu2 %546 }
  0xb3   : > { %v491_v12 = vpop.permute.xlu1 %490  ;;  %v511_v34 = vmul.f32 %v508_v10, %v505_v25  ;;  %v510_v52 = vmul.f32 %v508_v10, %v502_v45 }
  0xb4   : > { %v494_v6 = vmul.f32 %v491_v12, %v488_v20  ;;  %v493_v42 = vmul.f32 %v491_v12, %v487_v32 }
  0xb6   : > { %v496_v31 = vadd.f32 %v494_v6, %v477_v28  ;;  %v495_v51 = vadd.f32 %v493_v42, %v476_v48 }
  0xb8   : > { %v513_v36 = vadd.f32 %v511_v34, %v496_v31  ;;  %v512_v39 = vadd.f32 %v510_v52, %v495_v51 }
  0xba   : > { %v1266_v46 = vpop.permute.xlu2 %565 }
  0xbb   : > { %v517_v37 = vpop.permute.xlu1 %516  ;;  %v536_v38 = vpop.permute.xlu0 %535 }
  0xbc   : > { %v522_v33 = vsel %vm518_vm11, %v517_v37, 0.0 }
  0xbd   : > { %v524_v3 = vsel %vm1206_vm6, %v522_v33, 0.0 }
  0xbe   : > { %v530_v44 = vmul.f32 %v1217_v57, %v524_v3 }
  0xc0   : > { %v532_v50 = vadd.f32 %v530_v44, %v513_v36 }
  0xc2   : > { %v1268_v53 = vadd.f32 %v536_v38, %v532_v50  ;;  %v1280_v0 = vpop.permute.xlu2 %579 }
  0xc3   : > { %v515_v54 = vpop.permute.xlu1 %514  ;;  %v1276_v59 = vpop.permute.xlu0 %556 }
  0xc4   : > { %v1271_v55 = vmul.f32 0.70710677, %v1268_v53  ;;  %v519_v56 = vsel %vm518_vm11, %v515_v54, %v517_v37 }
  0xc5   : > { %v523_v58 = vsel %vm1224_vm9, %v519_v56, 0.0 }
  0xc6   : > { %v709_v43 = vand.u32 2147483647, %v1271_v55  ;;  %v529_v60 = vmul.f32 %v1217_v57, %v523_v58 }
  0xc8   : > { %v711_v61 = vmul.f32 0.3275911, %v709_v43  ;;  %v531_v63 = vadd.f32 %v529_v60, %v512_v39  ;;  %v763_v45 = vsub.f32 0.0, %v709_v43 }
  0xca   : > { %v713_v1 = vadd.f32 1.0, %v711_v61  ;;  %v1284_v4 = vadd.f32 %v536_v38, %v531_v63  ;;  %v1294_v11 = vpop.permute.xlu2 %597  ;;  %v765_v54 = vmul.f32 %v763_v45, %v709_v43 }
  0xcb   : > { %v1282_v2 = vpop.permute.xlu1 %544 }
  0xcc   : > { %978 = vrcp.f32 %v713_v1  ;;  %v582_v5 = vpop.permute.xlu0 %581  ;;  %v1287_v7 = vmul.f32 0.70710677, %v1284_v4  ;;  %v740_v16 = vand.u32 2147483648, %v713_v1  ;;  %v738_v20 = vand.u32 2147483647, %v713_v1 }
  0xcd   : > { %vm734_vm13 = vweird.f32 %v713_v1  ;;  %v548_v60 = vsel %vm372_vm1, %v1282_v2, %v1244_v21 }
  0xce   : > { %v1290_v9 = vand.u32 2147483647, %v1287_v7  ;;  %v741_v25 = vor.u32 1.1754944e-38, %v740_v16  ;;  %vm739_vm15 = vcmp.eq.f32.partialorder %v738_v20, 8.507059e+37  ;;  %v553_v43 = vsel %vm1201_vm4, %v548_v60, 0.0 }
  0xd0   : > { %v710_v12 = vmul.f32 0.3275911, %v1290_v9  ;;  %v762_v16 = vsub.f32 0.0, %v1290_v9 }
  0xd2   : > { %v979_v8 = vpop.eup %978  ;;  %v712_v17 = vadd.f32 1.0, %v710_v12  ;;  %v1299_v19 = vpop.permute.xlu2 %616 }
  0xd3   : > { %v730_v10 = vmul.f32 %v979_v8, %v713_v1  ;;  %v1292_v57 = vpop.permute.xlu1 %563  ;;  %vm735_vm12 = vweird.f32 %v979_v8  ;;  %v768_v1 = vmul.f32 1.442695, %v765_v54  ;;  %v619_v49 = vmul.f32 %v1129_v15, %v1299_v19 }
  0xd4   : > { %980 = vrcp.f32 %v712_v17  ;;  %v600_v24 = vpop.permute.xlu0 %599  ;;  %vm736_vm14 = vmor %vm734_vm13, %vm735_vm12  ;;  %v725_v33 = vand.u32 2147483648, %v712_v17  ;;  %v723_v3 = vand.u32 2147483647, %v712_v17  ;;  %vm719_vm13 = vweird.f32 %v712_v17 }
  0xd5   : > { %v731_v13 = vsub.f32 1.0, %v730_v10  ;;  %v567_v12 = vsel %vm396_vm0, %v1292_v57, %v1266_v46  ;;  %v601_v21 = vsel %vm436_vm5, %v1294_v11, %v600_v24  ;;  %982 = vpow2.f32 %v768_v1 }
  0xd6   : > { %v726_v44 = vor.u32 1.1754944e-38, %v725_v33  ;;  %v764_v24 = vmul.f32 %v762_v16, %v1290_v9  ;;  %v783_v9 = vld [vmem:[%s1424_s7] sm:$0xf] }
  0xd7   : > { %v732_v18 = vmul.f32 %v979_v8, %v731_v13  ;;  %786 = vperm.xlu1 %977, %v783_v9  }
  0xd9   : > { %v733_v6 = vadd.f32 %v979_v8, %v732_v18 }
  0xda   : > { %v981_v30 = vpop.eup %980 }
  0xdb   : > { %v1297_v26 = vpop.permute.xlu1 %572  ;;  %v737_v27 = vsel %vm736_vm14, %v979_v8, %v733_v6  ;;  %v715_v34 = vmul.f32 %v981_v30, %v712_v17  ;;  %vm720_vm12 = vweird.f32 %v981_v30  ;;  %v1305_v42 = vpop.permute.xlu2 %634  ;;  %v583_v8 = vsel %vm413_vm3, %v1280_v0, %v582_v5 }
  0xdc   : > { %v742_v28 = vsel %vm739_vm15, %v741_v25, %v737_v27  ;;  %v1301_v38 = vpop.permute.xlu0 %625  ;;  %vm721_vm14 = vmor %vm719_vm13, %vm720_vm12  ;;  %vm724_vm15 = vcmp.eq.f32.partialorder %v723_v3, 8.507059e+37  ;;  %v576_v17 = vmul.f32 %v1297_v26, %v567_v12  ;;  %v588_v5 = vsel %vm1206_vm6, %v583_v8, 0.0 }
  0xdd   : > { %v745_v29 = vmul.f32 1.0614054, %v742_v28  ;;  %v716_v37 = vsub.f32 1.0, %v715_v34  ;;  %v560_v6 = vmul.f32 %v1276_v59, %v553_v43  ;;  %v606_v27 = vsel %vm1201_vm4, %v601_v21, 0.0 }
  0xdf   : > { %v747_v31 = vadd.f32 -1.4531521, %v745_v29  ;;  %v717_v40 = vmul.f32 %v981_v30, %v716_v37  ;;  %v551_v37 = vsel %vm372_vm1, 0.0, %v1282_v2  ;;  %v586_v2 = vsel %vm413_vm3, 0.0, %v1280_v0 }
  0xe0   : > { %vm705_vm1 = vcmp.lt.f32.partialorder %v1271_v55, 0.0  ;;  %v604_v0 = vsel %vm436_vm5, 0.0, %v1294_v11  ;;  %vm836_vm3 = vcmask 1043456  }
  0xe1   : > { %v749_v35 = vmul.f32 %v747_v31, %v742_v28  ;;  %v718_v41 = vadd.f32 %v981_v30, %v717_v40  ;;  %v605_v12 = vsel %vm1167_vm2, %v604_v0, 0.0  ;;  %v700_v0 = vmul.f32 0.5, %v1284_v4 }
  0xe3   : > { %v751_v22 = vadd.f32 1.4214138, %v749_v35  ;;  %v722_v48 = vsel %vm721_vm14, %v981_v30, %v718_v41  ;;  %v578_v30 = vadd.f32 %v576_v17, %v560_v6  ;;  %v766_v41 = vmul.f32 1.442695, %v764_v24 }
  0xe4   : > { %v1303_v32 = vpop.permute.xlu1 %590  ;;  %v1307_v50 = vsel %vm724_vm15, %v726_v44, %v722_v48  ;;  %v1310_v58 = vpop.permute.xlu0 %643 }
  0xe5   : > { %v753_v36 = vmul.f32 %v751_v22, %v742_v28  ;;  %v744_v51 = vmul.f32 1.0614054, %v1307_v50  ;;  %v1325_v13 = vpop.permute.xlu2 %652  ;;  %v594_v46 = vmul.f32 %v1303_v32, %v588_v5  ;;  %v630_v22 = vsel %vm463_vm7, %v1301_v38, 0.0 }
  0xe6   : > { %v632_v45 = vsel %vm1206_vm6, %v630_v22, 0.0  ;;  %v648_v54 = vsel %vm482_vm8, %v1310_v58, 0.0  ;;  %984 = vpow2.f32 %v766_v41  ;;  %v701_v41 = vmul.f32 0.5, %v1268_v53 }
  0xe7   : > { %v755_v52 = vadd.f32 -0.28449672, %v753_v36  ;;  %v746_v56 = vadd.f32 -1.4531521, %v744_v51  ;;  %v596_v40 = vadd.f32 %v594_v46, %v578_v30  ;;  %v983_v36 = vpop.eup %982  ;;  %v570_v51 = vsel %vm396_vm0, 0.0, %v1292_v57 }
  0xe8   : > { %v575_v60 = vmul.f32 %v1297_v26, %v570_v51  ;;  %v650_v8 = vsel %vm1201_vm4, %v648_v54, 0.0  ;;  %vm704_vm0 = vcmp.lt.f32.partialorder %v1287_v7, 0.0 }
  0xe9   : > { %v748_v61 = vmul.f32 %v746_v56, %v1307_v50  ;;  %v757_v63 = vmul.f32 %v755_v52, %v742_v28  ;;  %v620_v52 = vmul.f32 %v1127_v14, %v1299_v19  ;;  %v587_v14 = vsel %vm1224_vm9, %v586_v2, 0.0 }
  0xea   : > { %v593_v26 = vmul.f32 %v1303_v32, %v587_v14  ;;  %v656_v47 = vmul.f32 %v1325_v13, %v650_v8 }
  0xeb   : > { %v750_v10 = vadd.f32 1.4214138, %v748_v61  ;;  %v759_v20 = vadd.f32 0.2548296, %v757_v63  ;;  %v638_v63 = vmul.f32 %v1305_v42, %v632_v45 }
  0xec   : > { %v1340_v34 = vpop.permute.xlu0 %661  ;;  %v985_v5 = vpop.eup %984 }
  0xed   : > { %v1312_v39 = vpop.permute.xlu1 %608  ;;  %v752_v18 = vmul.f32 %v750_v10, %v1307_v50  ;;  %v761_v35 = vmul.f32 %v759_v20, %v742_v28  ;;  %v1347_v3 = vpop.permute.xlu2 %677  ;;  %v552_v28 = vsel %vm1167_vm2, %v551_v37, 0.0 }
  0xee   : > { %v612_v31 = vmul.f32 %v1312_v39, %v606_v27  ;;  %v559_v57 = vmul.f32 %v1276_v59, %v552_v28  ;;  %v682_v55 = vsel %vm518_vm11, %v1347_v3, 0.0  ;;  %v1011_v59 = vmov 1.0  }
  0xef   : > { %v754_v25 = vadd.f32 -0.28449672, %v752_v18  ;;  %v771_v48 = vmul.f32 %v983_v36, %v761_v35  ;;  %v707_v21 = vsel %vm705_vm1, -1.0, %v1011_v59  ;;  %v611_v17 = vmul.f32 %v1312_v39, %v605_v12 }
  0xf0   : > { %v614_v44 = vadd.f32 %v612_v31, %v596_v40  ;;  %v577_v11 = vadd.f32 %v575_v60, %v559_v57  ;;  %v684_v20 = vsel %vm1206_vm6, %v682_v55, 0.0  ;;  %v666_v39 = vsel %vm501_vm10, %v1340_v34, 0.0 }
  0xf1   : > { %v756_v33 = vmul.f32 %v754_v25, %v1307_v50  ;;  %v773_v10 = vsub.f32 1.0, %v771_v48  ;;  %v706_v23 = vsel %vm704_vm0, -1.0, %v1011_v59 }
  0xf2   : > { %v622_v1 = vadd.f32 %v620_v52, %v614_v44  ;;  %v595_v46 = vadd.f32 %v593_v26, %v577_v11 }
  0xf3   : > { %v758_v56 = vadd.f32 0.2548296, %v756_v33  ;;  %v775_v6 = vmul.f32 %v773_v10, %v707_v21 }
  0xf4   : > { %v660_v16 = vpop.permute.xlu0 %659  ;;  %v640_v18 = vadd.f32 %v638_v63, %v622_v1  ;;  %v613_v31 = vadd.f32 %v611_v17, %v595_v46 }
  0xf5   : > { %v624_v29 = vpop.permute.xlu1 %623  ;;  %v760_v43 = vmul.f32 %v758_v56, %v1307_v50  ;;  %v687_v50 = vpop.permute.xlu2 %686  ;;  %v777_v22 = vadd.f32 1.0, %v775_v6  ;;  %v663_v28 = vsel %vm501_vm10, %v660_v16, %v1340_v34 }
  0xf6   : > { %v627_v32 = vsel %vm463_vm7, %v624_v29, %v1301_v38  ;;  %v658_v38 = vadd.f32 %v656_v47, %v640_v18  ;;  %v690_v35 = vmul.f32 %v687_v50, %v684_v20  ;;  %v621_v9 = vadd.f32 %v619_v49, %v613_v31 }
  0xf7   : > { %v770_v27 = vmul.f32 %v985_v5, %v760_v43  ;;  %v631_v24 = vsel %vm1224_vm9, %v627_v32, 0.0  ;;  %v779_v19 = vmul.f32 %v777_v22, %v701_v41 }
  0xf9   : > { %v772_v33 = vsub.f32 1.0, %v770_v27 }
  0xfc   : > { %v696_v15 = vpop.permute.xlu0 %695 }
  0xfd   : > { %v642_v61 = vpop.permute.xlu1 %641 }
  0xfe   : > { %v645_v25 = vsel %vm482_vm8, %v642_v61, %v1310_v58  ;;  %v637_v58 = vmul.f32 %v1305_v42, %v631_v24  ;;  %v774_v42 = vmul.f32 %v772_v33, %v706_v23 }
  0xff   : > { %v649_v37 = vsel %vm1167_vm2, %v645_v25, 0.0  ;;  %vm789_vm2 = vcmask 64512  }
 0x100   : > { %v655_v36 = vmul.f32 %v1325_v13, %v649_v37  ;;  %v639_v2 = vadd.f32 %v637_v58, %v621_v9  ;;  %v782_v13 = vld [vmem:[%s1423_s6] sm:$0xf]  ;;  %v776_v60 = vadd.f32 1.0, %v774_v42 }
 0x102   : > { %v657_v52 = vadd.f32 %v655_v36, %v639_v2 }
 0x105   : > { %v669_v30 = vpop.permute.xlu1 %668 }
 0x106   : > { %v672_v29 = vmul.f32 %v669_v30, %v666_v39  ;;  %v671_v45 = vmul.f32 %v669_v30, %v663_v28 }
 0x108   : > { %v674_v40 = vadd.f32 %v672_v29, %v658_v38  ;;  %v673_v54 = vadd.f32 %v671_v45, %v657_v52 }
 0x10a   : > { %v692_v44 = vadd.f32 %v690_v35, %v674_v40 }
 0x10c   : > { %v699_v48 = vadd.f32 %v696_v15, %v692_v44 }
 0x10d   : > { %v676_v51 = vpop.permute.xlu1 %675 }
 0x10e   : > { %v679_v7 = vsel %vm518_vm11, %v676_v51, %v1347_v3  ;;  %v781_v53 = vmul.f32 %v779_v19, %v699_v48  ;;  %v778_v3 = vmul.f32 %v776_v60, %v700_v0 }
 0x10f   : > { %v683_v34 = vsel %vm1224_vm9, %v679_v7, 0.0 }
 0x110   : > { %v689_v56 = vmul.f32 %v687_v50, %v683_v34  ;;  %828 = vmatpush.msra.mxu1 %v781_v53 }
 0x111   : > { %927 = vmatmul.msk.f32.vlgmr.msra.gmra.mxu1 %vm789_vm2, %v782_v13 }
 0x112   : > { %v691_v61 = vadd.f32 %v689_v56, %v673_v54 }
 0x114   : > { %v698_v63 = vadd.f32 %v696_v15, %v691_v61 }
 0x116   : > { %v780_v1 = vmul.f32 %v778_v3, %v698_v63 }
 0x118   : > { %808 = vmatpush.msra.mxu0 %v780_v1 }
 0x119   : > { %926 = vmatmul.msk.f32.vlgmr.msra.gmra.mxu0 %vm789_vm2, %v782_v13 }
 0x149   : > { %v787_v57 = vpop.permute.xlu1 %786 }
 0x18e   : > { %v830_v14 = vpop.f32.mrf.mxu1 }
 0x18f   : > { %v831_v8 = vadd.f32 %v830_v14, %v787_v57 }
 0x191   : > { %v835_v62 = vrot.slane %v831_v8, 4 }
 0x196   : > { %v810_v10 = vpop.f32.mrf.mxu0 }
 0x197   : > { %v811_v26 = vadd.f32 %v810_v10, %v787_v57 }
 0x199   : > { %v837_v55 = vsel %vm836_vm3, %v811_v26, %v835_v62 }
 0x19a   : > { %839 = vst [vmem:[%s328_s17] sm:$0xff] %v837_v55 }
 0x19b PF: > { %s18_s27 = sadd.s32 1, %s992_s27  }
 0x19c   : > { %p15_p4 = scmp.ge.s32.totalorder %s18_s27, 4  }
 0x19e   :  { %17 = sbr.rel (!%p15_p4) target bundleno = 1 (0x1), region = 85 }

</bundles_post_ra>
